<compile_context>
chip_gen: v6e
topology: v6e:2x2x1
jax: 0.10.0
libtpu: 0.0.40
codegen_flags: <defaults>
</compile_context>

<pallas_src>
import functools

import numpy as np
import jax
import jax.numpy as jnp
from jax.experimental import pallas as pl
from jax.experimental.pallas import tpu as pltpu

# ---------------- synthetic Config (mirrors fields FeatureEmbed uses) --------
EMBED = 32          # embed_size
TABLES = 10         # config.tablenum
TYPES = 8           # config.types
COLUMNS = 20        # config.columns
OPS = 6             # config.opsnum
POS = 5             # pos
MAXJOINS = 3        # config.maxjoins

FILT_DIM = 2 * EMBED + 3 * EMBED // 8 + 1      # 77  (natural filter width)
JOIN_IN = 2 * MAXJOINS * EMBED                 # 192
JOIN_HID = 3 * EMBED                           # 96
JOIN_PAD = 128                                 # join hidden padded 96 -> 128
EST_OUT = EMBED // 2                           # 16
OUT_DIM = EMBED * 7 + 8 * (EMBED // 8) + 1     # 257 (natural output width)
EXTRA_DIM = TYPES + TABLES + POS + 4           # 27  (type/table/pos one-hots + db_est)
FEAT_DIM = 1 + MAXJOINS + 12 + 3 + 1 + 1 + 4   # 25


def _round_up(x, m):
    return ((x + m - 1) // m) * m


# ------------------------------ Pallas kernel --------------------------------
def feature_embed_kernel(
    filt_x_ref, mask_ref, join_x_ref, extra_ref,
    wf1_ref, bf1_ref, wf2_ref, bf2_ref,
    wj1_ref, bj1_ref, wj2_ref, bj2_ref,
    wp_filt_ref, wp_join_ref, wp_extra_ref, bp_ref,
    out_ref,
):
    leaky = lambda x: jnp.where(x > 0, x, 0.01 * x)            # F.leaky_relu
    dot = functools.partial(jnp.dot, preferred_element_type=jnp.float32)
    cd = wf1_ref.dtype                                         # matmul operand dtype
    tb = out_ref.shape[0]

    # --- filter path: the 3 slots are fused into one M=3*TB matmul pair ---
    fx = filt_x_ref[...].reshape(3 * tb, FILT_DIM)             # (3*TB, 77)
    h = leaky(dot(fx, wf1_ref[...]) + bf1_ref[...])            # linearFilter
    h = leaky(dot(h.astype(cd), wf2_ref[...]) + bf2_ref[...])  # linearFilter2
    h = h.reshape(3, tb, FILT_DIM)
    # mask_ref is pre-scaled by 1/(num_filters + 1e-10): exact masked mean.
    filt_avg = h[0] * mask_ref[0] + h[1] * mask_ref[1] + h[2] * mask_ref[2]

    # --- join path: linearJoin1 -> linearJoin2 (hidden padded 96 -> 128) ---
    j = leaky(dot(join_x_ref[...], wj1_ref[...]) + bj1_ref[...])   # (TB, 128)
    j = leaky(dot(j.astype(cd), wj2_ref[...]) + bj2_ref[...])

    # --- projection: two big-K dots + one tiny (TB,27)@(27,257) dot that covers
    # the folded type/table/pos/linearest contributions, + fused bias ---
    z = (dot(filt_avg.astype(cd), wp_filt_ref[...])
         + dot(j.astype(cd), wp_join_ref[...])
         + dot(extra_ref[...], wp_extra_ref[...])
         + bp_ref[...])
    out_ref[...] = leaky(z)                                    # (TB, 257)


def _resident_spec(arr):
    """Weight/bias spec: block == full array, constant index map (VMEM-resident)."""
    nd = arr.ndim
    return pl.BlockSpec(arr.shape, lambda i, _nd=nd: (0,) * _nd)


# -------------------------------- wrapper -------------------------------------
def feature_embed_forward(params, feature, *, tb=512, compute_dtype=jnp.bfloat16):
    """tb: batch tile (rounded to a multiple of 8).  The kernel is HBM-bound, so a
    large tile (512-1024) amortizes the ~0.35us per-grid-step cost; the tiler keeps
    >= 2 grid steps when the batch allows so v7x's two TensorCores both get work.
    compute_dtype: bf16 operands (f32 accumulation) is the production default on
    v5e/v6e/v7x; pass jnp.float32 for a tight numerical comparison."""
    B = feature.shape[0]
    splits = np.cumsum([1, MAXJOINS, 12, 3, 1, 1])
    typeId, join, filtersId, filtersMask, posId, table, db_est = jnp.split(
        feature, splits, axis=-1)

    type_idx = typeId[:, 0].astype(jnp.int32)
    table_idx = table[:, 0].astype(jnp.int32)
    pos_idx = posId[:, 0].astype(jnp.int32)

    # --- join input (B, 192) (embedding gathers = glue) ---
    join_x = jnp.take(params["columnEmbed"], join.astype(jnp.int32),
                      axis=0).reshape(B, JOIN_IN)

    # --- filter input, slot-major (3, B, 77): natural width, no lane padding ---
    fe = filtersId.reshape(B, 4, 3).transpose(0, 2, 1)                       # (B,3,4)
    col = jnp.take(params["columnEmbed"], fe[:, :, 0].astype(jnp.int32), axis=0)
    op = jnp.take(params["opEmbed"], fe[:, :, 1].astype(jnp.int32), axis=0)
    vals = fe[:, :, 2][..., None]
    dt = jnp.take(params["dtypeEmbed"], fe[:, :, 3].astype(jnp.int32), axis=0)
    filt_x = jnp.concatenate([col, op, vals, dt], axis=-1).transpose(1, 0, 2)  # (3,B,77)

    # --- mask pre-scaled by 1/(num_filters + eps): kernel does an exact weighted sum
    m = filtersMask.astype(jnp.float32)                                      # (B, 3)
    inv = 1.0 / (jnp.sum(m, axis=1, keepdims=True) + 1e-10)
    mask = (m * inv).T[..., None]                                            # (3, B, 1)

    # --- compact per-row "extra" feature: one-hots + db_est -> (B, 27) ---
    extra = jnp.concatenate([
        jax.nn.one_hot(type_idx, TYPES, dtype=jnp.float32),
        jax.nn.one_hot(table_idx, TABLES, dtype=jnp.float32),
        jax.nn.one_hot(pos_idx, POS, dtype=jnp.float32),
        db_est.astype(jnp.float32),
    ], axis=-1)

    # --- split projection weight along the final-concat layout ---
    wp_splits = np.cumsum([EMBED, FILT_DIM, JOIN_HID, EMBED, EMBED // 8])
    wp_type, wp_filt, wp_join, wp_table, wp_pos, wp_est = jnp.split(
        params["Wp"], wp_splits, axis=0)

    # --- resident (27, 257) table folding the tiny-K terms + fused (1, 257) bias ---
    wp_extra = jnp.concatenate([
        params["typeEmbed"] @ wp_type,        # (TYPES, 257)
        params["tableEmbed"] @ wp_table,      # (TABLES, 257)
        params["posEmbed"] @ wp_pos,          # (POS, 257)
        params["We"] @ wp_est,                # (4, 257)   (linearest folded)
    ], axis=0)                                                                # (27, 257)
    bp = (params["be"] @ wp_est + params["bp"]).reshape(1, -1)                # (1, 257)

    # --- join hidden 96 -> 128 (zero pads keep math identical; leaky(0) == 0) ---
    pad_h = JOIN_PAD - JOIN_HID
    wj1 = jnp.pad(params["Wj1"], ((0, 0), (0, pad_h)))                        # (192,128)
    bj1 = jnp.pad(params["bj1"], (0, pad_h)).reshape(1, -1)                   # (1,128)
    wj2 = jnp.pad(params["Wj2"], ((0, pad_h), (0, pad_h)))                    # (128,128)
    bj2 = jnp.pad(params["bj2"], (0, pad_h)).reshape(1, -1)                   # (1,128)
    wp_join_p = jnp.pad(wp_join, ((0, pad_h), (0, 0)))                        # (128,257)

    bf1 = params["bf1"].reshape(1, -1)
    bf2 = params["bf2"].reshape(1, -1)

    # --- batch tiling / padding; keep >= 2 grid steps when the batch allows so the
    # "parallel" batch axis shards across both TensorCores on v7x ---
    tb = max(8, _round_up(tb, 8))
    B8 = _round_up(B, 8)
    TB = min(tb, B8)
    if B8 // TB < 2 and B8 >= 16:
        TB = _round_up((B8 + 1) // 2, 8)
    B_pad = _round_up(B, TB)
    pad_b = B_pad - B
    if pad_b:
        filt_x = jnp.pad(filt_x, ((0, 0), (0, pad_b), (0, 0)))
        mask = jnp.pad(mask, ((0, 0), (0, pad_b), (0, 0)))
        join_x = jnp.pad(join_x, ((0, pad_b), (0, 0)))
        extra = jnp.pad(extra, ((0, pad_b), (0, 0)))

    cd = compute_dtype
    args = (
        filt_x.astype(cd), mask, join_x.astype(cd), extra.astype(cd),
        params["Wf1"].astype(cd), bf1, params["Wf2"].astype(cd), bf2,
        wj1.astype(cd), bj1, wj2.astype(cd), bj2,
        wp_filt.astype(cd), wp_join_p.astype(cd), wp_extra.astype(cd), bp,
    )

    in_specs = [
        pl.BlockSpec((3, TB, FILT_DIM), lambda i: (0, i, 0)),    # filt_x
        pl.BlockSpec((3, TB, 1), lambda i: (0, i, 0)),           # mask (pre-scaled)
        pl.BlockSpec((TB, JOIN_IN), lambda i: (i, 0)),           # join_x
        pl.BlockSpec((TB, EXTRA_DIM), lambda i: (i, 0)),         # extra
    ] + [_resident_spec(a) for a in args[4:]]                    # weights / biases

    out = pl.pallas_call(
        feature_embed_kernel,
        out_shape=jax.ShapeDtypeStruct((B_pad, OUT_DIM), jnp.float32),
        grid=(B_pad // TB,),
        in_specs=in_specs,
        out_specs=pl.BlockSpec((TB, OUT_DIM), lambda i: (i, 0)),
        compiler_params=pltpu.CompilerParams(
            dimension_semantics=("parallel",),          # 2-TC sharding on v7x
            vmem_limit_bytes=32 * 1024 * 1024,          # raises v5e's 16 MiB default
        ),
    )(*args)
    return out[:B]


# ---------------------------- parameter init ----------------------------------
def init_params(key):
    ks = jax.random.split(key, 18)
    n = lambda k, shape: 0.1 * jax.random.normal(k, shape, jnp.float32)
    p = {}
    p["typeEmbed"] = n(ks[0], (TYPES, EMBED))
    p["tableEmbed"] = n(ks[1], (TABLES, EMBED))
    p["columnEmbed"] = n(ks[2], (COLUMNS, 2 * EMBED))
    p["opEmbed"] = n(ks[3], (OPS, EMBED // 8))
    p["dtypeEmbed"] = n(ks[4], (4, EMBED // 4))
    p["posEmbed"] = n(ks[5], (POS, EMBED // 8))
    # Linears stored as (in, out): y = x @ W + b  (transposed vs. torch's (out,in)).
    p["Wf1"], p["bf1"] = n(ks[6], (FILT_DIM, FILT_DIM)), n(ks[7], (FILT_DIM,))
    p["Wf2"], p["bf2"] = n(ks[8], (FILT_DIM, FILT_DIM)), n(ks[9], (FILT_DIM,))
    p["Wj1"], p["bj1"] = n(ks[10], (JOIN_IN, JOIN_HID)), n(ks[11], (JOIN_HID,))
    p["Wj2"], p["bj2"] = n(ks[12], (JOIN_HID, JOIN_HID)), n(ks[13], (JOIN_HID,))
    p["We"], p["be"] = n(ks[14], (4, EST_OUT)), n(ks[15], (EST_OUT,))
    p["Wp"], p["bp"] = n(ks[16], (OUT_DIM, OUT_DIM)), n(ks[17], (OUT_DIM,))
    return p


# ------------------------- pure-JAX reference (for check) ---------------------
def reference_forward(params, feature):
    B = feature.shape[0]
    splits = np.cumsum([1, MAXJOINS, 12, 3, 1, 1])
    typeId, join, filtersId, filtersMask, posId, table, db_est = jnp.split(
        feature, splits, axis=-1)
    leaky = lambda x: jnp.where(x > 0, x, 0.01 * x)

    typeEmb = jnp.take(params["typeEmbed"], typeId[:, 0].astype(jnp.int32), axis=0)
    tableEmb = jnp.take(params["tableEmbed"], table[:, 0].astype(jnp.int32), axis=0)
    posEmb = jnp.take(params["posEmbed"], posId[:, 0].astype(jnp.int32), axis=0)

    joinsEmb = jnp.take(params["columnEmbed"], join.astype(jnp.int32),
                        axis=0).reshape(B, JOIN_IN)
    j = leaky(joinsEmb @ params["Wj1"] + params["bj1"])
    j = leaky(j @ params["Wj2"] + params["bj2"])

    fe = filtersId.reshape(B, 4, 3).transpose(0, 2, 1)
    col = jnp.take(params["columnEmbed"], fe[:, :, 0].astype(jnp.int32), axis=0)
    op = jnp.take(params["opEmbed"], fe[:, :, 1].astype(jnp.int32), axis=0)
    vals = fe[:, :, 2][..., None]
    dt = jnp.take(params["dtypeEmbed"], fe[:, :, 3].astype(jnp.int32), axis=0)
    c = jnp.concatenate([col, op, vals, dt], axis=-1)
    c = leaky(c @ params["Wf1"] + params["bf1"])
    c = leaky(c @ params["Wf2"] + params["bf2"])
    c = c * filtersMask[..., None]
    num = jnp.sum(filtersMask, axis=1) + 1e-10
    filt = jnp.sum(c, axis=1) / num[:, None]

    e = db_est @ params["We"] + params["be"]
    final = jnp.concatenate([typeEmb, filt, j, tableEmb, posEmb, e], axis=1)
    return leaky(final @ params["Wp"] + params["bp"])


# ----------------------------------- main --------------------------------------
if __name__ == "__main__":
    key = jax.random.PRNGKey(0)
    pkey, fkey = jax.random.split(key)
    params = init_params(pkey)

    B = 20
    ks = jax.random.split(fkey, 10)
    typeId = jax.random.randint(ks[0], (B, 1), 0, TYPES).astype(jnp.float32)
    join = jax.random.randint(ks[1], (B, MAXJOINS), 0, COLUMNS).astype(jnp.float32)
    colsId = jax.random.randint(ks[2], (B, 3), 0, COLUMNS).astype(jnp.float32)
    opsId = jax.random.randint(ks[3], (B, 3), 0, OPS).astype(jnp.float32)
    vals = jax.random.uniform(ks[4], (B, 3), jnp.float32)
    dtypeId = jax.random.randint(ks[5], (B, 3), 0, 4).astype(jnp.float32)
    # Laid out so that view(-1,4,3).transpose(1,2) recovers (cols, ops, vals, dtype).
    filtersId = jnp.concatenate([colsId, opsId, vals, dtypeId], axis=-1)      # (B, 12)
    filtersMask = (jax.random.uniform(ks[6], (B, 3)) > 0.3).astype(jnp.float32)
    posId = jax.random.randint(ks[7], (B, 1), 0, POS).astype(jnp.float32)
    table = jax.random.randint(ks[8], (B, 1), 0, TABLES).astype(jnp.float32)
    db_est = jax.random.uniform(ks[9], (B, 4), jnp.float32)

    feature = jnp.concatenate(
        [typeId, join, filtersId, filtersMask, posId, table, db_est], axis=-1)
    assert feature.shape == (B, FEAT_DIM)

    ref = jax.block_until_ready(reference_forward(params, feature))

    # Strict check: f32 operands; tb=8 exercises the multi-step batch grid
    # (B=20 -> B_pad=24 -> 3 steps) with resident weights and batch padding.
    out = feature_embed_forward(params, feature, tb=8, compute_dtype=jnp.float32)
    out = jax.block_until_ready(out)
    assert out.shape == (B, OUT_DIM) and out.dtype == jnp.float32
    np.testing.assert_allclose(np.asarray(out), np.asarray(ref), rtol=1e-2, atol=1e-2)

    # Smoke-test the production defaults: tb=512 (auto-halved so the tiny batch still
    # spans 2 grid steps -> both v7x TCs get work) with bf16 matmul operands.
    out_bf16 = jax.block_until_ready(feature_embed_forward(params, feature))
    assert out_bf16.shape == (B, OUT_DIM)
    assert bool(jnp.all(jnp.isfinite(out_bf16)))
    np.testing.assert_allclose(np.asarray(out_bf16), np.asarray(ref),
                               rtol=0.1, atol=0.05)

    print("KERNEL_OK")
</pallas_src>

<mosaic_0001>
module attributes {stable_mosaic.version = 11 : i64} {
  func.func @feature_embed_kernel(%arg0: i32, %arg1: memref<3x8x77xf32, #tpu.memory_space<vmem>>, %arg2: memref<3x8x1xf32, #tpu.memory_space<vmem>>, %arg3: memref<8x192xf32, #tpu.memory_space<vmem>>, %arg4: memref<8x27xf32, #tpu.memory_space<vmem>>, %arg5: memref<77x77xf32, #tpu.memory_space<vmem>>, %arg6: memref<1x77xf32, #tpu.memory_space<vmem>>, %arg7: memref<77x77xf32, #tpu.memory_space<vmem>>, %arg8: memref<1x77xf32, #tpu.memory_space<vmem>>, %arg9: memref<192x128xf32, #tpu.memory_space<vmem>>, %arg10: memref<1x128xf32, #tpu.memory_space<vmem>>, %arg11: memref<128x128xf32, #tpu.memory_space<vmem>>, %arg12: memref<1x128xf32, #tpu.memory_space<vmem>>, %arg13: memref<77x257xf32, #tpu.memory_space<vmem>>, %arg14: memref<128x257xf32, #tpu.memory_space<vmem>>, %arg15: memref<27x257xf32, #tpu.memory_space<vmem>>, %arg16: memref<1x257xf32, #tpu.memory_space<vmem>>, %arg17: memref<8x257xf32, #tpu.memory_space<vmem>>) attributes {dimension_semantics = [#tpu.dimension_semantics<parallel>], iteration_bounds = array<i64: 3>, scalar_prefetch = 0 : i64, scratch_operands = 0 : i64, tpu.core_type = #tpu.core_type<tc>, window_params = [{transform_indices = @transform_0, window_bounds = array<i64: 3, 8, 77>}, {transform_indices = @transform_1, window_bounds = array<i64: 3, 8, 1>}, {transform_indices = @transform_2, window_bounds = array<i64: 8, 192>}, {transform_indices = @transform_3, window_bounds = array<i64: 8, 27>}, {pipeline_mode = #tpu.pipeline_mode<synchronous>, transform_indices = @transform_4, window_bounds = array<i64: 77, 77>}, {pipeline_mode = #tpu.pipeline_mode<synchronous>, transform_indices = @transform_5, window_bounds = array<i64: 1, 77>}, {pipeline_mode = #tpu.pipeline_mode<synchronous>, transform_indices = @transform_6, window_bounds = array<i64: 77, 77>}, {pipeline_mode = #tpu.pipeline_mode<synchronous>, transform_indices = @transform_7, window_bounds = array<i64: 1, 77>}, {pipeline_mode = #tpu.pipeline_mode<synchronous>, transform_indices = @transform_8, window_bounds = array<i64: 192, 128>}, {pipeline_mode = #tpu.pipeline_mode<synchronous>, transform_indices = @transform_9, window_bounds = array<i64: 1, 128>}, {pipeline_mode = #tpu.pipeline_mode<synchronous>, transform_indices = @transform_10, window_bounds = array<i64: 128, 128>}, {pipeline_mode = #tpu.pipeline_mode<synchronous>, transform_indices = @transform_11, window_bounds = array<i64: 1, 128>}, {pipeline_mode = #tpu.pipeline_mode<synchronous>, transform_indices = @transform_12, window_bounds = array<i64: 77, 257>}, {pipeline_mode = #tpu.pipeline_mode<synchronous>, transform_indices = @transform_13, window_bounds = array<i64: 128, 257>}, {pipeline_mode = #tpu.pipeline_mode<synchronous>, transform_indices = @transform_14, window_bounds = array<i64: 27, 257>}, {pipeline_mode = #tpu.pipeline_mode<synchronous>, transform_indices = @transform_15, window_bounds = array<i64: 1, 257>}, {transform_indices = @transform_16, window_bounds = array<i64: 8, 257>}]} {
    %c0 = arith.constant 0 : index
    %c0_0 = arith.constant 0 : index
    %c0_1 = arith.constant 0 : index
    %0 = vector.load %arg1[%c0, %c0_0, %c0_1] : memref<3x8x77xf32, #tpu.memory_space<vmem>>, vector<3x8x77xf32>
    %1 = vector.shape_cast %0 : vector<3x8x77xf32> to vector<24x77xf32>
    %c0_2 = arith.constant 0 : index
    %c0_3 = arith.constant 0 : index
    %2 = vector.load %arg5[%c0_2, %c0_3] : memref<77x77xf32, #tpu.memory_space<vmem>>, vector<77x77xf32>
    %cst = arith.constant dense<0.000000e+00> : vector<24x77xf32>
    %3 = tpu.matmul %1, %2, %cst {dimension_numbers = #tpu.dot_dimension_numbers<[1], [0], [0], [1], [0, 0, 1, 1], [], []>} : vector<24x77xf32>, vector<77x77xf32>, vector<24x77xf32> -> vector<24x77xf32>
    %c0_4 = arith.constant 0 : index
    %c0_5 = arith.constant 0 : index
    %4 = vector.load %arg6[%c0_4, %c0_5] : memref<1x77xf32, #tpu.memory_space<vmem>>, vector<1x77xf32>
    %5 = vector.broadcast %4 : vector<1x77xf32> to vector<24x77xf32>
    %6 = arith.addf %3, %5 : vector<24x77xf32>
    %cst_6 = arith.constant 0.000000e+00 : f32
    %7 = vector.broadcast %cst_6 : f32 to vector<24x77xf32>
    %8 = arith.cmpf ogt, %6, %7 : vector<24x77xf32>
    %cst_7 = arith.constant 0.00999999977 : f32
    %9 = vector.broadcast %cst_7 : f32 to vector<24x77xf32>
    %10 = arith.mulf %9, %6 : vector<24x77xf32>
    %11 = arith.select %8, %6, %10 : vector<24x77xi1>, vector<24x77xf32>
    %c0_8 = arith.constant 0 : index
    %c0_9 = arith.constant 0 : index
    %12 = vector.load %arg7[%c0_8, %c0_9] : memref<77x77xf32, #tpu.memory_space<vmem>>, vector<77x77xf32>
    %cst_10 = arith.constant dense<0.000000e+00> : vector<24x77xf32>
    %13 = tpu.matmul %11, %12, %cst_10 {dimension_numbers = #tpu.dot_dimension_numbers<[1], [0], [0], [1], [0, 0, 1, 1], [], []>} : vector<24x77xf32>, vector<77x77xf32>, vector<24x77xf32> -> vector<24x77xf32>
    %c0_11 = arith.constant 0 : index
    %c0_12 = arith.constant 0 : index
    %14 = vector.load %arg8[%c0_11, %c0_12] : memref<1x77xf32, #tpu.memory_space<vmem>>, vector<1x77xf32>
    %15 = vector.broadcast %14 : vector<1x77xf32> to vector<24x77xf32>
    %16 = arith.addf %13, %15 : vector<24x77xf32>
    %cst_13 = arith.constant 0.000000e+00 : f32
    %17 = vector.broadcast %cst_13 : f32 to vector<24x77xf32>
    %18 = arith.cmpf ogt, %16, %17 : vector<24x77xf32>
    %cst_14 = arith.constant 0.00999999977 : f32
    %19 = vector.broadcast %cst_14 : f32 to vector<24x77xf32>
    %20 = arith.mulf %19, %16 : vector<24x77xf32>
    %21 = arith.select %18, %16, %20 : vector<24x77xi1>, vector<24x77xf32>
    %22 = vector.shape_cast %21 : vector<24x77xf32> to vector<3x8x77xf32>
    %23 = vector.extract_strided_slice %22 {offsets = [0, 0, 0], sizes = [1, 8, 77], strides = [1, 1, 1]} : vector<3x8x77xf32> to vector<1x8x77xf32>
    %24 = vector.shape_cast %23 : vector<1x8x77xf32> to vector<8x77xf32>
    %c0_15 = arith.constant 0 : index
    %c0_16 = arith.constant 0 : index
    %c0_17 = arith.constant 0 : index
    %25 = vector.load %arg2[%c0_15, %c0_16, %c0_17] : memref<3x8x1xf32, #tpu.memory_space<vmem>>, vector<1x8x1xf32>
    %26 = vector.shape_cast %25 : vector<1x8x1xf32> to vector<8x1xf32>
    %27 = vector.broadcast %26 : vector<8x1xf32> to vector<8x77xf32>
    %28 = arith.mulf %24, %27 : vector<8x77xf32>
    %29 = vector.extract_strided_slice %22 {offsets = [1, 0, 0], sizes = [1, 8, 77], strides = [1, 1, 1]} : vector<3x8x77xf32> to vector<1x8x77xf32>
    %30 = vector.shape_cast %29 : vector<1x8x77xf32> to vector<8x77xf32>
    %c1 = arith.constant 1 : index
    %c0_18 = arith.constant 0 : index
    %c0_19 = arith.constant 0 : index
    %31 = vector.load %arg2[%c1, %c0_18, %c0_19] : memref<3x8x1xf32, #tpu.memory_space<vmem>>, vector<1x8x1xf32>
    %32 = vector.shape_cast %31 : vector<1x8x1xf32> to vector<8x1xf32>
    %33 = vector.broadcast %32 : vector<8x1xf32> to vector<8x77xf32>
    %34 = arith.mulf %30, %33 : vector<8x77xf32>
    %35 = arith.addf %28, %34 : vector<8x77xf32>
    %36 = vector.extract_strided_slice %22 {offsets = [2, 0, 0], sizes = [1, 8, 77], strides = [1, 1, 1]} : vector<3x8x77xf32> to vector<1x8x77xf32>
    %37 = vector.shape_cast %36 : vector<1x8x77xf32> to vector<8x77xf32>
    %c2 = arith.constant 2 : index
    %c0_20 = arith.constant 0 : index
    %c0_21 = arith.constant 0 : index
    %38 = vector.load %arg2[%c2, %c0_20, %c0_21] : memref<3x8x1xf32, #tpu.memory_space<vmem>>, vector<1x8x1xf32>
    %39 = vector.shape_cast %38 : vector<1x8x1xf32> to vector<8x1xf32>
    %40 = vector.broadcast %39 : vector<8x1xf32> to vector<8x77xf32>
    %41 = arith.mulf %37, %40 : vector<8x77xf32>
    %42 = arith.addf %35, %41 : vector<8x77xf32>
    %c0_22 = arith.constant 0 : index
    %c0_23 = arith.constant 0 : index
    %43 = vector.load %arg3[%c0_22, %c0_23] : memref<8x192xf32, #tpu.memory_space<vmem>>, vector<8x192xf32>
    %c0_24 = arith.constant 0 : index
    %c0_25 = arith.constant 0 : index
    %44 = vector.load %arg9[%c0_24, %c0_25] : memref<192x128xf32, #tpu.memory_space<vmem>>, vector<192x128xf32>
    %cst_26 = arith.constant dense<0.000000e+00> : vector<8x128xf32>
    %45 = tpu.matmul %43, %44, %cst_26 {dimension_numbers = #tpu.dot_dimension_numbers<[1], [0], [0], [1], [0, 0, 1, 1], [], []>} : vector<8x192xf32>, vector<192x128xf32>, vector<8x128xf32> -> vector<8x128xf32>
    %c0_27 = arith.constant 0 : index
    %c0_28 = arith.constant 0 : index
    %46 = vector.load %arg10[%c0_27, %c0_28] : memref<1x128xf32, #tpu.memory_space<vmem>>, vector<1x128xf32>
    %47 = vector.broadcast %46 : vector<1x128xf32> to vector<8x128xf32>
    %48 = arith.addf %45, %47 : vector<8x128xf32>
    %cst_29 = arith.constant 0.000000e+00 : f32
    %49 = vector.broadcast %cst_29 : f32 to vector<8x128xf32>
    %50 = arith.cmpf ogt, %48, %49 : vector<8x128xf32>
    %cst_30 = arith.constant 0.00999999977 : f32
    %51 = vector.broadcast %cst_30 : f32 to vector<8x128xf32>
    %52 = arith.mulf %51, %48 : vector<8x128xf32>
    %53 = arith.select %50, %48, %52 : vector<8x128xi1>, vector<8x128xf32>
    %c0_31 = arith.constant 0 : index
    %c0_32 = arith.constant 0 : index
    %54 = vector.load %arg11[%c0_31, %c0_32] : memref<128x128xf32, #tpu.memory_space<vmem>>, vector<128x128xf32>
    %cst_33 = arith.constant dense<0.000000e+00> : vector<8x128xf32>
    %55 = tpu.matmul %53, %54, %cst_33 {dimension_numbers = #tpu.dot_dimension_numbers<[1], [0], [0], [1], [0, 0, 1, 1], [], []>} : vector<8x128xf32>, vector<128x128xf32>, vector<8x128xf32> -> vector<8x128xf32>
    %c0_34 = arith.constant 0 : index
    %c0_35 = arith.constant 0 : index
    %56 = vector.load %arg12[%c0_34, %c0_35] : memref<1x128xf32, #tpu.memory_space<vmem>>, vector<1x128xf32>
    %57 = vector.broadcast %56 : vector<1x128xf32> to vector<8x128xf32>
    %58 = arith.addf %55, %57 : vector<8x128xf32>
    %cst_36 = arith.constant 0.000000e+00 : f32
    %59 = vector.broadcast %cst_36 : f32 to vector<8x128xf32>
    %60 = arith.cmpf ogt, %58, %59 : vector<8x128xf32>
    %cst_37 = arith.constant 0.00999999977 : f32
    %61 = vector.broadcast %cst_37 : f32 to vector<8x128xf32>
    %62 = arith.mulf %61, %58 : vector<8x128xf32>
    %63 = arith.select %60, %58, %62 : vector<8x128xi1>, vector<8x128xf32>
    %c0_38 = arith.constant 0 : index
    %c0_39 = arith.constant 0 : index
    %64 = vector.load %arg13[%c0_38, %c0_39] : memref<77x257xf32, #tpu.memory_space<vmem>>, vector<77x257xf32>
    %cst_40 = arith.constant dense<0.000000e+00> : vector<8x257xf32>
    %65 = tpu.matmul %42, %64, %cst_40 {dimension_numbers = #tpu.dot_dimension_numbers<[1], [0], [0], [1], [0, 0, 1, 1], [], []>} : vector<8x77xf32>, vector<77x257xf32>, vector<8x257xf32> -> vector<8x257xf32>
    %c0_41 = arith.constant 0 : index
    %c0_42 = arith.constant 0 : index
    %66 = vector.load %arg14[%c0_41, %c0_42] : memref<128x257xf32, #tpu.memory_space<vmem>>, vector<128x257xf32>
    %cst_43 = arith.constant dense<0.000000e+00> : vector<8x257xf32>
    %67 = tpu.matmul %63, %66, %cst_43 {dimension_numbers = #tpu.dot_dimension_numbers<[1], [0], [0], [1], [0, 0, 1, 1], [], []>} : vector<8x128xf32>, vector<128x257xf32>, vector<8x257xf32> -> vector<8x257xf32>
    %68 = arith.addf %65, %67 : vector<8x257xf32>
    %c0_44 = arith.constant 0 : index
    %c0_45 = arith.constant 0 : index
    %69 = vector.load %arg4[%c0_44, %c0_45] : memref<8x27xf32, #tpu.memory_space<vmem>>, vector<8x27xf32>
    %c0_46 = arith.constant 0 : index
    %c0_47 = arith.constant 0 : index
    %70 = vector.load %arg15[%c0_46, %c0_47] : memref<27x257xf32, #tpu.memory_space<vmem>>, vector<27x257xf32>
    %cst_48 = arith.constant dense<0.000000e+00> : vector<8x257xf32>
    %71 = tpu.matmul %69, %70, %cst_48 {dimension_numbers = #tpu.dot_dimension_numbers<[1], [0], [0], [1], [0, 0, 1, 1], [], []>} : vector<8x27xf32>, vector<27x257xf32>, vector<8x257xf32> -> vector<8x257xf32>
    %72 = arith.addf %68, %71 : vector<8x257xf32>
    %c0_49 = arith.constant 0 : index
    %c0_50 = arith.constant 0 : index
    %73 = vector.load %arg16[%c0_49, %c0_50] : memref<1x257xf32, #tpu.memory_space<vmem>>, vector<1x257xf32>
    %74 = vector.broadcast %73 : vector<1x257xf32> to vector<8x257xf32>
    %75 = arith.addf %72, %74 : vector<8x257xf32>
    %cst_51 = arith.constant 0.000000e+00 : f32
    %76 = vector.broadcast %cst_51 : f32 to vector<8x257xf32>
    %77 = arith.cmpf ogt, %75, %76 : vector<8x257xf32>
    %cst_52 = arith.constant 0.00999999977 : f32
    %78 = vector.broadcast %cst_52 : f32 to vector<8x257xf32>
    %79 = arith.mulf %78, %75 : vector<8x257xf32>
    %80 = arith.select %77, %75, %79 : vector<8x257xi1>, vector<8x257xf32>
    %c0_53 = arith.constant 0 : index
    %c0_54 = arith.constant 0 : index
    %81 = vector.load %arg17[%c0_53, %c0_54] : memref<8x257xf32, #tpu.memory_space<vmem>>, vector<8x257xf32>
    tpu.vector_store %arg17[%c0_53, %c0_54], %80 {strides = array<i32>} : memref<8x257xf32, #tpu.memory_space<vmem>>, vector<8x257xf32>,
    return
  }
  func.func @transform_0(%arg0: i32) -> (i32, i32, i32) {
    %c0_i32 = arith.constant 0 : i32
    %c0_i32_0 = arith.constant 0 : i32
    %c0_i32_1 = arith.constant 0 : i32
    return %c0_i32, %arg0, %c0_i32_0 : i32, i32, i32
  }
  func.func @transform_1(%arg0: i32) -> (i32, i32, i32) {
    %c0_i32 = arith.constant 0 : i32
    %c0_i32_0 = arith.constant 0 : i32
    %c0_i32_1 = arith.constant 0 : i32
    return %c0_i32, %arg0, %c0_i32_0 : i32, i32, i32
  }
  func.func @transform_2(%arg0: i32) -> (i32, i32) {
    %c0_i32 = arith.constant 0 : i32
    %c0_i32_0 = arith.constant 0 : i32
    return %arg0, %c0_i32 : i32, i32
  }
  func.func @transform_3(%arg0: i32) -> (i32, i32) {
    %c0_i32 = arith.constant 0 : i32
    %c0_i32_0 = arith.constant 0 : i32
    return %arg0, %c0_i32 : i32, i32
  }
  func.func @transform_4(%arg0: i32) -> (i32, i32) {
    %c0_i32 = arith.constant 0 : i32
    %c0_i32_0 = arith.constant 0 : i32
    %c0_i32_1 = arith.constant 0 : i32
    return %c0_i32, %c0_i32_0 : i32, i32
  }
  func.func @transform_5(%arg0: i32) -> (i32, i32) {
    %c0_i32 = arith.constant 0 : i32
    %c0_i32_0 = arith.constant 0 : i32
    %c0_i32_1 = arith.constant 0 : i32
    return %c0_i32, %c0_i32_0 : i32, i32
  }
  func.func @transform_6(%arg0: i32) -> (i32, i32) {
    %c0_i32 = arith.constant 0 : i32
    %c0_i32_0 = arith.constant 0 : i32
    %c0_i32_1 = arith.constant 0 : i32
    return %c0_i32, %c0_i32_0 : i32, i32
  }
  func.func @transform_7(%arg0: i32) -> (i32, i32) {
    %c0_i32 = arith.constant 0 : i32
    %c0_i32_0 = arith.constant 0 : i32
    %c0_i32_1 = arith.constant 0 : i32
    return %c0_i32, %c0_i32_0 : i32, i32
  }
  func.func @transform_8(%arg0: i32) -> (i32, i32) {
    %c0_i32 = arith.constant 0 : i32
    %c0_i32_0 = arith.constant 0 : i32
    %c0_i32_1 = arith.constant 0 : i32
    return %c0_i32, %c0_i32_0 : i32, i32
  }
  func.func @transform_9(%arg0: i32) -> (i32, i32) {
    %c0_i32 = arith.constant 0 : i32
    %c0_i32_0 = arith.constant 0 : i32
    %c0_i32_1 = arith.constant 0 : i32
    return %c0_i32, %c0_i32_0 : i32, i32
  }
  func.func @transform_10(%arg0: i32) -> (i32, i32) {
    %c0_i32 = arith.constant 0 : i32
    %c0_i32_0 = arith.constant 0 : i32
    %c0_i32_1 = arith.constant 0 : i32
    return %c0_i32, %c0_i32_0 : i32, i32
  }
  func.func @transform_11(%arg0: i32) -> (i32, i32) {
    %c0_i32 = arith.constant 0 : i32
    %c0_i32_0 = arith.constant 0 : i32
    %c0_i32_1 = arith.constant 0 : i32
    return %c0_i32, %c0_i32_0 : i32, i32
  }
  func.func @transform_12(%arg0: i32) -> (i32, i32) {
    %c0_i32 = arith.constant 0 : i32
    %c0_i32_0 = arith.constant 0 : i32
    %c0_i32_1 = arith.constant 0 : i32
    return %c0_i32, %c0_i32_0 : i32, i32
  }
  func.func @transform_13(%arg0: i32) -> (i32, i32) {
    %c0_i32 = arith.constant 0 : i32
    %c0_i32_0 = arith.constant 0 : i32
    %c0_i32_1 = arith.constant 0 : i32
    return %c0_i32, %c0_i32_0 : i32, i32
  }
  func.func @transform_14(%arg0: i32) -> (i32, i32) {
    %c0_i32 = arith.constant 0 : i32
    %c0_i32_0 = arith.constant 0 : i32
    %c0_i32_1 = arith.constant 0 : i32
    return %c0_i32, %c0_i32_0 : i32, i32
  }
  func.func @transform_15(%arg0: i32) -> (i32, i32) {
    %c0_i32 = arith.constant 0 : i32
    %c0_i32_0 = arith.constant 0 : i32
    %c0_i32_1 = arith.constant 0 : i32
    return %c0_i32, %c0_i32_0 : i32, i32
  }
  func.func @transform_16(%arg0: i32) -> (i32, i32) {
    %c0_i32 = arith.constant 0 : i32
    %c0_i32_0 = arith.constant 0 : i32
    return %arg0, %c0_i32 : i32, i32
  }
}

</mosaic_0001>

<bundles_post_ra>
// kernel: tpu_custom_call.1
= control target key start
LH: loop header
LB: loop body
LE: loop exit
PB: predicated region body
PF: predicated region fallthrough
CT: control target
= control target key end

     0   :  { %s3325_s0 = inlined_call_operand.hbm [shape: f32[3,24,77], index: 0, kind: input, shape index: {}]   ;;  %s3326_s1 = inlined_call_operand.vmem [shape: f32[3,24,1], index: 1, kind: input, shape index: {}]   ;;  %s3327_s2 = inlined_call_operand.vmem [shape: f32[24,192], index: 2, kind: input, shape index: {}]   ;;  %s3328_s3 = inlined_call_operand.hbm [shape: f32[24,27], index: 3, kind: input, shape index: {}]   ;;  %s3329_s4 = inlined_call_operand.hbm [shape: f32[77,77], index: 4, kind: input, shape index: {}]   ;;  %s3330_s5 = inlined_call_operand.vmem [shape: f32[1,77], index: 5, kind: input, shape index: {}]   ;;  %s3331_s6 = inlined_call_operand.hbm [shape: f32[77,77], index: 6, kind: input, shape index: {}]   ;;  %s3332_s7 = inlined_call_operand.vmem [shape: f32[1,77], index: 7, kind: input, shape index: {}]   ;;  %s3333_s8 = inlined_call_operand.vmem [shape: f32[192,128], index: 8, kind: input, shape index: {}]   ;;  %s3334_s9 = inlined_call_operand.vmem [shape: f32[1,128], index: 9, kind: input, shape index: {}]   ;;  %s3335_s10 = inlined_call_operand.vmem [shape: f32[128,128], index: 10, kind: input, shape index: {}]   ;;  %s3336_s11 = inlined_call_operand.vmem [shape: f32[1,128], index: 11, kind: input, shape index: {}]   ;;  %s3337_s12 = inlined_call_operand.vmem [shape: f32[77,257], index: 12, kind: input, shape index: {}]   ;;  %s3338_s13 = inlined_call_operand.vmem [shape: f32[128,257], index: 13, kind: input, shape index: {}]   ;;  %s3339_s14 = inlined_call_operand.vmem [shape: f32[27,257], index: 14, kind: input, shape index: {}]   ;;  %s3340_s15 = inlined_call_operand.vmem [shape: f32[1,257], index: 15, kind: input, shape index: {}]   ;;  %s3341_s16 = inlined_call_operand.hbm [shape: f32[24,257], index: 16, kind: output, shape index: {}]  }
   0x1   :  { %3357 = sst [smem:[#allocation23_spill]] %s3325_s0 }
   0x2   :  { %3358 = sst [smem:[#allocation24_spill]] %s3326_s1 }
   0x3   :  { %3359 = sst [smem:[#allocation25_spill]] %s3329_s4 }
   0x4   :  { %3360 = sst [smem:[#allocation26_spill]] %s3331_s6 }
   0x5   :  { %3361 = sst [smem:[#allocation27_spill]] %s3340_s15 }
   0x6   :  { %3362 = sst [smem:[#allocation28_spill]] %s3341_s16 }
   0x7   :  { %21 = vsyncpa [#allocation3], 0 }
   0x8   :  { %23 = vsyncpa [#allocation3 + $0x1], 0 }
   0x9   :  { %24 = vsyncpa [#allocation7], 0 }
   0xa   :  { %26 = vsyncpa [#allocation7 + $0x1], 0 }
   0xb   :  { %27 = vsyncpa [#allocation10], 0 }
   0xc   :  { %28 = vsyncpa [#allocation4], 0 }
   0xd   :  { %30 = vsyncpa [#allocation4 + $0x1], 0  ;;  %s2533_s21 = smov 0   ;;  %s2535_s22 = smov 0  }
   0xe   :  { %s2537_s23 = smov 0   ;;  %s2539_s24 = smov 0  }
   0xf LB: > { %3363 = sst [smem:[#allocation17_spill]] %s2421_s21  ;;  %s2554_s25 = sadd.s32 4294967295, %s2433_s24   ;;  %s2433_s24 = sphi %s2539_s24, %s3393_s24   ;;  %s2429_s23 = sphi %s2537_s23, %s3395_s23   ;;  %s2425_s22 = sphi %s2535_s22, %s3397_s22   ;;  %s2421_s21 = sphi %s2533_s21, %s3396_s21  }
  0x10   : > { %3364 = sst [smem:[#allocation18_spill]] %s2429_s23  ;;  %s1893_s26 = sadd.s32 4294967294, %s2433_s24  }
  0x11   : > { %s2558_s27 = sadd.s32 1, %s2433_s24   ;;  %s43_s28 = sadd.s32 1, %s2429_s23 }
  0x12   : > { %3365 = sst [smem:[#allocation19_spill]] %s2558_s27  ;;  %s40_s29 = ssub.s32 %s2433_s24, %s2558_s27 }
  0x13   : > { %p50_p0 = scmp.ne.s32.totalorder %s2429_s23, %s2425_s22  ;;  %p41_p1 = scmp.eq.s32.totalorder %s40_s29, 0 }
  0x14   : > { %p51_p2 = scmp.eq.s32.totalorder %s2433_s24, 0  ;;  %p56_p3 = scmp.ne.s32.totalorder %s2425_s22, %s2421_s21 }
  0x15   : > { %p3350_p4 = scmp.eq.s32.totalorder %s2554_s25, 0  ;;  %p410_p7 = scmp.eq.s32.totalorder %s2554_s25, 2 }
  0x16   : > { %s2570_s30 = scalar_select %p41_p1, %s2429_s23, %s43_s28  }
  0x17   : > { %p2572_p5 = por %p51_p2, %p50_p0  ;;  %p2578_p6 = por %p3350_p4, %p56_p3 }
  0x18   : > { %3366 = sst [smem:[#allocation20_spill]] %s2570_s30  ;;  %p416_p8 = scmp.eq.s32.totalorder %s1893_s26, 2 }
  0x19   : > { %s3368_s17 = scalar_select %p2578_p6, 1, 0 }
  0x1a   : > { %p1894_p9 = scmp.ge.s32.totalorder %s2433_s24, 1  ;;  %p423_p10 = scmp.lt.s32.totalorder %s2433_s24, 4 }
  0x1b   : > { %p2585_p11 = por %p410_p7, %p50_p0  ;;  %p2589_p12 = por %p416_p8, %p56_p3 }
  0x1c   : > { %p2593_p13 = pnand %p1894_p9, %p423_p10  ;;  %s2435_s28 = smov [#allocation8]  }
  0x1d   : > { %s3369_s18 = scalar_select %p2585_p11, 1, 0 }
  0x1e   : > { %s3371_s19 = scalar_select %p2589_p12, 1, 0 }
  0x1f   : > { %3370 = sst [smem:[#allocation21_spill]] %s3369_s18  ;;  %p2193_p1 = pneg %p2593_p13 }
  0x20   : > { %3372 = sst [smem:[#allocation22_spill]] %s3371_s19  ;;  %s435_s29 = sshll.u32 %s2435_s28, 4  ;;  %s436_s29 = int_to_ptr.vmem [resolvable:$true] %s435_s29 }
  0x21   : > { %p2601_p2 = pnand %p2193_p1, %p3350_p4  ;;  %s2436_s30 = smov [#allocation9]  }
  0x22   : > { %s451_s27 = sshll.u32 %s2436_s30, 4  ;;  %s2264_s19 = scalar_lea.vmem %s436_s29, 1280  ;;  %s452_s27 = int_to_ptr.vmem [resolvable:$true] %s451_s27 }
  0x23   : > { %p2255_p0 = pneg %p2601_p2  ;;  %p2265_p3 = scmp.ne.s32.totalorder %s436_s29, %s2264_s19 }
  0x24   : > { %p2272_p9 = scmp.lt.s32.totalorder %s436_s29, %s436_s29  ;;  %p2273_p10 = scmp.lt.s32.totalorder %s2264_s19, %s2264_s19 }
  0x25   : > { %p2267_p7 = pnand %p2265_p3, %p2255_p0 }
  0x26   : > { %p2274_p12 = por %p2273_p10, %p2272_p9 }
  0x27   : > { %p2268_p8 = pneg %p2267_p7 }
  0x29   : > { %p2275_p1 = pnand %p2274_p12, %p2268_p8 }
  0x2b   : > { %2278 = shalt.err (!%p2275_p1)
}
  0x2c   : > { %s2437_s28 = smov 128   ;;  %s2438_s21 = smov 8  }
  0x2d   : > { %s3375_s4 = sld [smem:[#allocation25_spill]]  ;;  %s2290_s18 = scalar_lea.vmem %s452_s27, 1280 }
  0x2e   : > { %p2291_p4 = scmp.ne.s32.totalorder %s452_s27, %s2290_s18  ;;  %p2298_p11 = scmp.lt.s32.totalorder %s452_s27, %s452_s27 }
  0x2f   : > { %p2299_p6 = scmp.lt.s32.totalorder %s2290_s18, %s2290_s18 }
  0x30   : > { %p2293_p3 = pnand %p2291_p4, %p2255_p0 }
  0x31   : > { %p2300_p9 = por %p2299_p6, %p2298_p11 }
  0x32   : > { %p2294_p7 = pneg %p2293_p3 }
  0x33   : > { %2196 = dma.hbm_to_vmem [thread:$0]  (!%p2601_p2), %s3375_s4, 1280, %s436_s29, [#allocation7], %s2437_s28, %s2437_s28, %s2438_s21  }
  0x34   : > { %p2301_p12 = pnand %p2300_p9, %p2294_p7 }
  0x36   : > { %2304 = shalt.err (!%p2301_p12)
}
  0x37   : > { %s3376_s6 = sld [smem:[#allocation26_spill]]  ;;  %p1897_p8 = scmp.ge.s32.totalorder %s2433_s24, 3 }
  0x38   : > { %s2625_s16 = sand.u32 (!%p1897_p8), 1, %s2429_s23   ;;  %s3354_s18 = sshll.u32 (!%p1897_p8), %s2433_s24, 7 }
  0x39   : > { %488 = sbr.rel (%p1897_p8) target bundleno = 121 (0x79), region = 64  ;;  %s3377_s4 = sld [smem:[#allocation23_spill]] (!%p1897_p8) }
  0x3a   : > { %s3355_s29 = smul.u32 (!%p1897_p8), 24, %s2625_s16 }
  0x3d   : > { %2199 = dma.hbm_to_vmem [thread:$0]  (!%p2601_p2), %s3376_s6, 1280, %s452_s27, [#allocation10], %s2437_s28, %s2437_s28, %s2438_s21  }
  0x3e   : > { %s496_s21 = scalar_lea.vmem [#allocation2], %s3355_s29  ;;  %s493_s28 = scalar_lea.sflag [#allocation3], %s2625_s16 }
  0x3f   : > { %s2634_s15 = scalar_lea.hbm %s3377_s4, %s3354_s18  ;;  %s502_s27 = sshll.u32 %s496_s21, 4  ;;  %s2638_s27 = int_to_ptr.vmem [resolvable:$true] %s502_s27 }
  0x40   : > { %s2305_s19 = scalar_lea.hbm %s2634_s15, 384  ;;  %s2309_s26 = scalar_lea.hbm %s3377_s4, 1152 }
  0x41   : > { %p2306_p4 = scmp.ne.s32.totalorder %s2634_s15, %s2305_s19  ;;  %p2310_p2 = scmp.lt.s32.totalorder %s2634_s15, %s3377_s4 }
  0x42   : > { %p2311_p0 = scmp.lt.s32.totalorder %s2309_s26, %s2305_s19 }
  0x43   : > { %p2307_p6 = pnand %p2306_p4, %p2572_p5 }
  0x44   : > { %p2312_p10 = por %p2311_p0, %p2310_p2 }
  0x45   : > { %p2308_p11 = pneg %p2307_p6 }
  0x47   : > { %p2313_p1 = pnand %p2312_p10, %p2308_p11 }
  0x49   : > { %2316 = shalt.err (!%p2313_p1)
}
  0x4a   : > { %s2317_s21 = scalar_lea.vmem %s2638_s27, 384  ;;  %s2439_s29 = smov [#allocation2]  }
  0x4b   : > { %p2318_p3 = scmp.ne.s32.totalorder %s2638_s27, %s2317_s21  ;;  %s2321_s6 = sshll.u32 %s2439_s29, 4  ;;  %s2322_s6 = int_to_ptr.vmem [resolvable:$false] %s2321_s6 }
  0x4c   : > { %s2323_s23 = scalar_lea.vmem %s2322_s6, 768  ;;  %p2324_p12 = scmp.lt.s32.totalorder %s2638_s27, %s2322_s6 }
  0x4d   : > { %p2319_p7 = pnand %p2318_p3, %p2572_p5  ;;  %p2325_p8 = scmp.lt.s32.totalorder %s2323_s23, %s2317_s21 }
  0x4f   : > { %p2320_p9 = pneg %p2319_p7  ;;  %p2326_p4 = por %p2325_p8, %p2324_p12 }
  0x51   : > { %p2327_p6 = pnand %p2326_p4, %p2320_p9 }
  0x53   : > { %2330 = shalt.err (!%p2327_p6)
}
  0x54   : > { %s2440_s18 = smov 384   ;;  %s2441_s19 = smov 128  }
  0x55   : > { %s2442_s26 = smov 8   ;;  %511 = sbr.rel (!%p2572_p5) target bundleno = 97 (0x61), region = 72 }
  0x56   : > { %2183 = dma.hbm_to_vmem [thread:$0]  (%p2572_p5), %s2634_s15, 384, %s2638_s27, %s493_s28, %s2440_s18, %s2441_s19, %s2442_s26  }
  0x57   : > { %s1899_s29 = sshll.u32 (%p2572_p5), %s2433_s24, 3  ;;  %s3378_s1 = sld [smem:[#allocation24_spill]] (%p2572_p5) }
  0x58   : > { %s3379_s23 = smul.u32 (%p2572_p5), 24, %s2625_s16 }
  0x5a   : > { %s515_s4 = scalar_lea.vmem [#allocation5], %s3379_s23 }
  0x5d   : > { %s517_s6 = scalar_lea.vmem %s3378_s1, %s1899_s29 }
  0x5e   : > { %v550_v0 = vld [vmem:[%s517_s6] sm:$0xff]  ;;  %v552_v1 = vld [vmem:[%s517_s6 + $0x18] sm:$0xff]  ;;  %v554_v2 = vld [vmem:[%s517_s6 + $0x30] sm:$0xff] }
  0x5f   : > { %551 = vst [vmem:[%s515_s4] sm:$0xff] %v550_v0  ;;  %553 = vst [vmem:[%s515_s4 + $0x8] sm:$0xff] %v552_v1 }
  0x60   : > { %555 = vst [vmem:[%s515_s4 + $0x10] sm:$0xff] %v554_v2 }
  0x61 PF: > { %s570_s15 = sand.u32 1, %s2433_s24   ;;  %s1900_s27 = sshll.u32 %s2625_s16, 3 }
  0x62   : > { %s3380_s28 = sshll.u32 %s2433_s24, 7  ;;  %s574_s29 = scalar_lea.vmem [#allocation6], %s1900_s27 }
  0x63   : > { %s2678_s26 = scalar_lea.hbm %s3328_s3, %s3380_s28  ;;  %s581_s30 = sshll.u32 %s574_s29, 4  ;;  %s582_s30 = int_to_ptr.vmem [resolvable:$true] %s581_s30 }
  0x64   : > { %s571_s4 = scalar_lea.sflag [#allocation7], %s570_s15  ;;  %s2331_s21 = scalar_lea.hbm %s2678_s26, 128 }
  0x65   : > { %p2332_p11 = scmp.ne.s32.totalorder %s2678_s26, %s2331_s21  ;;  %s2335_s23 = scalar_lea.hbm %s3328_s3, 384 }
  0x66   : > { %p2336_p10 = scmp.lt.s32.totalorder %s2678_s26, %s3328_s3  ;;  %p2337_p1 = scmp.lt.s32.totalorder %s2335_s23, %s2331_s21 }
  0x67   : > { %p2333_p2 = pnand %p2332_p11, %p2572_p5 }
  0x68   : > { %p2338_p3 = por %p2337_p1, %p2336_p10 }
  0x69   : > { %p2334_p0 = pneg %p2333_p2 }
  0x6b   : > { %p2339_p7 = pnand %p2338_p3, %p2334_p0 }
  0x6d   : > { %2342 = shalt.err (!%p2339_p7)
}
  0x6e   : > { %s2343_s27 = scalar_lea.vmem %s582_s30, 128  ;;  %s2443_s15 = smov [#allocation6]  }
  0x6f   : > { %p2344_p9 = scmp.ne.s32.totalorder %s582_s30, %s2343_s27  ;;  %s2347_s28 = sshll.u32 %s2443_s15, 4  ;;  %s2348_s28 = int_to_ptr.vmem [resolvable:$false] %s2347_s28 }
  0x70   : > { %s2349_s19 = scalar_lea.vmem %s2348_s28, 256  ;;  %p2350_p4 = scmp.lt.s32.totalorder %s582_s30, %s2348_s28 }
  0x71   : > { %p2345_p12 = pnand %p2344_p9, %p2572_p5  ;;  %p2351_p6 = scmp.lt.s32.totalorder %s2349_s19, %s2343_s27 }
  0x73   : > { %p2346_p8 = pneg %p2345_p12  ;;  %p2352_p11 = por %p2351_p6, %p2350_p4 }
  0x75   : > { %p2353_p2 = pnand %p2352_p11, %p2346_p8 }
  0x77   : > { %2356 = shalt.err (!%p2353_p2)
}
  0x78   : > { %2184 = dma.hbm_to_vmem [thread:$0]  (%p2572_p5), %s2678_s26, 128, %s582_s30, %s571_s4  }
  0x79 PF: > { %590 = sbr.rel (%p2593_p13) target bundleno = 854 (0x356), region = 118  ;;  %s2699_s1 = sand.u32 (!%p2593_p13), 1, %s2425_s22  }
  0x7a   : > { %s2702_s29 = smul.u32 (!%p2593_p13), 24, %s2699_s1  ;;  %s593_s21 = scalar_lea.sflag (!%p2593_p13), [#allocation3], %s2699_s1 }
  0x7b   : > { %p3381_p0 = scmp.ne.s32.totalorder (!%p2593_p13), %s3368_s17, 0 }
  0x7c   : > { %s2706_s6 = scalar_lea.vmem (!%p2593_p13), [#allocation2], %s2702_s29 }
  0x7e   : > { %2400 = dma.done.wait (%p3381_p0), %s593_s21, 384  }
  0x7f   : > { %2402 = vsyncadd (%p3381_p0), %s593_s21, 4294966912  ;;  %s608_s0 = sand.u32 1, %s2554_s25   ;;  %s1903_s20 = sshll.u32 %s2699_s1, 3 }
  0x80   : > { %s2715_s26 = scalar_lea.vmem [#allocation5], %s2702_s29  ;;  %s609_s30 = scalar_lea.sflag [#allocation7], %s608_s0 }
  0x81   : > { %s2717_s4 = scalar_lea.vmem [#allocation6], %s1903_s20 }
  0x82   : > { %2404 = dma.done.wait (%p3381_p0), %s609_s30, 128  }
  0x83   : > { %2406 = vsyncadd (%p3381_p0), %s609_s30, 4294967168  ;;  %p3382_p5 = scmp.eq.s32.totalorder %s2554_s25, 0 }
  0x85   : > { %2408 = dma.done.wait (%p3382_p5), [#allocation7], 1280   ;;  %p3383_p13 = pmov %p3382_p5 }
  0x86   : > { %p3384_p10 = pmov %p3382_p5 }
  0x87   : > { %2410 = vsyncadd (%p3383_p13), [#allocation7], 4294966016 }
  0x88   : > { %2412 = dma.done.wait (%p3384_p10), [#allocation10], 1280   ;;  %p3385_p1 = pmov %p3382_p5 }
  0x89   : > { %v2444_v3 = vmov 0.0   ;;  %vm2445_vm0 = vmmov 0   ;;  %vm718_vm1 = vcmask 1044480   ;;  %v700_v4 = vld [vmem:[#allocation8 + $0x48] sm:$0x1f]  ;;  %v699_v5 = vld [vmem:[#allocation8 + $0x40] sm:$0xff] }
  0x8a   : > { %2414 = vsyncadd (%p3385_p1), [#allocation10], 4294966016  ;;  %2013 = vmatprep.subr.mxu0 %v2444_v3  ;;  %2033 = vmatprep.mubr.msk.f32.mxu0 %vm2445_vm0, %v2444_v3  ;;  %v698_v6 = vld [vmem:[#allocation8 + $0x38] sm:$0xff]  ;;  %v697_v7 = vld [vmem:[#allocation8 + $0x30] sm:$0xff]  ;;  %p683_p3 = scmp.lt.s32.totalorder %s2554_s25, 2  ;;  %vm708_vm2 = vcmask 629760  }
  0x8b   : > { %2042 = vmatprep.subr.mxu1 %v2444_v3  ;;  %2062 = vmatprep.mubr.msk.f32.mxu1 %vm2445_vm0, %v2444_v3  ;;  %v696_v8 = vld [vmem:[#allocation8 + $0x28] sm:$0xff]  ;;  %v695_v9 = vld [vmem:[#allocation8 + $0x20] sm:$0xff]  ;;  %v694_v10 = vld [vmem:[#allocation8 + $0x18] sm:$0xff]  ;;  %vm987_vm3 = vcmask 523264   ;;  %v2446_v55 = vmov 0   ;;  %vm1549_vm12 = vcmask 1042432  }
  0x8c   : > { %2014 = vmatpush3.msk.msra.mxu0 %vm718_vm1, %v700_v4  ;;  %v693_v11 = vld [vmem:[#allocation8 + $0x10] sm:$0xff]  ;;  %v820_v12 = vld [vmem:[#allocation9 + $0x48] sm:$0x1f]  ;;  %v692_v14 = vld [vmem:[#allocation8 + $0x8] sm:$0xff]  ;;  %s684_s17 = scalar_select %p683_p3, %s2554_s25, 2  ;;  %2251 = vset.pattern.permute.xlu0 %v2446_v55  ;;  %vm1545_vm13 = vcmask 220160  }
  0x8d   : > { %2015 = vmatprep.subr.mxu0 %v2444_v3  ;;  %v819_v13 = vld [vmem:[#allocation9 + $0x40] sm:$0xff]  ;;  %2043 = vmatpush3.msk.msra.mxu1 %vm718_vm1, %v820_v12  ;;  %v818_v15 = vld [vmem:[#allocation9 + $0x38] sm:$0xff]  ;;  %v691_v16 = vld [vmem:[#allocation8] sm:$0xff]  ;;  %s3386_s23 = sld [smem:[#allocation27_spill]]  ;;  %s682_s18 = scalar_lea.vmem [#allocation11], %s2702_s29 }
  0x8e   : > { %2016 = vmatpush3.msra.mxu0 %v699_v5  ;;  %2044 = vmatprep.subr.mxu1 %v2444_v3  ;;  %v688_v17 = vld [vmem:[%s2706_s6] sm:$0xff]  ;;  %v817_v19 = vld [vmem:[#allocation9 + $0x30] sm:$0xff]  ;;  %s1936_s15 = sshll.u32 %s684_s17, 4  ;;  %v689_v21 = vld [vmem:[%s2706_s6 + $0x8] sm:$0xff]  ;;  %s3387_s27 = sld [smem:[#allocation21_spill]] }
  0x8f   : > { %2017 = vmatprep.subr.mxu0 %v2444_v3  ;;  %2045 = vmatpush3.msra.mxu1 %v819_v13  ;;  %v971_v18 = vld [vmem:[%s3333_s8 + $0x78] sm:$0xff]  ;;  %v970_v20 = vld [vmem:[%s3333_s8 + $0x70] sm:$0xff]  ;;  %v969_v22 = vld [vmem:[%s3333_s8 + $0x68] sm:$0xff]  ;;  %s2772_s20 = scalar_lea.vmem %s3327_s2, %s1936_s15  ;;  %s1737_s29 = scalar_lea.sflag [#allocation4], %s2699_s1 }
  0x90   : > { %2018 = vmatpush3.msra.mxu0 %v698_v6  ;;  %2046 = vmatprep.subr.mxu1 %v2444_v3  ;;  %v816_v23 = vld [vmem:[#allocation9 + $0x28] sm:$0xff]  ;;  %v968_v24 = vld [vmem:[%s3333_s8 + $0x60] sm:$0xff]  ;;  %v967_v26 = vld [vmem:[%s3333_s8 + $0x58] sm:$0xff] }
  0x91   : > { %2019 = vmatprep.subr.mxu0 %v2444_v3  ;;  %2047 = vmatpush3.msra.mxu1 %v818_v15  ;;  %v690_v25 = vld [vmem:[%s2706_s6 + $0x10] sm:$0xff]  ;;  %v815_v28 = vld [vmem:[#allocation9 + $0x20] sm:$0xff]  ;;  %v814_v30 = vld [vmem:[#allocation9 + $0x18] sm:$0xff]  ;;  %s1751_s6 = sshll.u32 %s682_s18, 4  ;;  %s1752_s6 = int_to_ptr.vmem [resolvable:$true] %s1751_s6 }
  0x92   : > { %2020 = vmatpush3.msra.mxu0 %v697_v7  ;;  %2048 = vmatprep.subr.mxu1 %v2444_v3  ;;  %v955_v27 = vld [vmem:[%s2772_s20 + $0x8] sm:$0xff]  ;;  %v966_v29 = vld [vmem:[%s3333_s8 + $0x50] sm:$0xff]  ;;  %v964_v32 = vld [vmem:[%s3333_s8 + $0x40] sm:$0xff] }
  0x93   : > { %2021 = vmatprep.subr.mxu0 %v2444_v3  ;;  %2049 = vmatpush3.msra.mxu1 %v817_v19  ;;  %v965_v31 = vld [vmem:[%s3333_s8 + $0x48] sm:$0xff]  ;;  %v963_v33 = vld [vmem:[%s3333_s8 + $0x38] sm:$0xff]  ;;  %v962_v34 = vld [vmem:[%s3333_s8 + $0x30] sm:$0xff] }
  0x94   : > { %2022 = vmatpush3.msra.mxu0 %v696_v8  ;;  %2050 = vmatprep.subr.mxu1 %v2444_v3  ;;  %v961_v35 = vld [vmem:[%s3333_s8 + $0x28] sm:$0xff]  ;;  %v960_v36 = vld [vmem:[%s3333_s8 + $0x20] sm:$0xff]  ;;  %v959_v37 = vld [vmem:[%s3333_s8 + $0x18] sm:$0xff]  ;;  %p3389_p9 = scmp.ne.s32.totalorder %s3387_s27, 0 }
  0x95   : > { %2023 = vmatprep.subr.mxu0 %v2444_v3  ;;  %2051 = vmatpush3.msra.mxu1 %v816_v23  ;;  %v958_v38 = vld [vmem:[%s3333_s8 + $0x10] sm:$0xff]  ;;  %v957_v39 = vld [vmem:[%s3333_s8 + $0x8] sm:$0xff]  ;;  %v956_v40 = vld [vmem:[%s3333_s8] sm:$0xff] }
  0x96   : > { %2024 = vmatpush3.msra.mxu0 %v695_v9  ;;  %2052 = vmatprep.subr.mxu1 %v2444_v3  ;;  %v979_v41 = vld [vmem:[%s3333_s8 + $0xb8] sm:$0xff]  ;;  %v978_v42 = vld [vmem:[%s3333_s8 + $0xb0] sm:$0xff]  ;;  %v977_v43 = vld [vmem:[%s3333_s8 + $0xa8] sm:$0xff] }
  0x97   : > { %2025 = vmatprep.subr.mxu0 %v2444_v3  ;;  %2053 = vmatpush3.msra.mxu1 %v815_v28  ;;  %v976_v44 = vld [vmem:[%s3333_s8 + $0xa0] sm:$0xff]  ;;  %v975_v45 = vld [vmem:[%s3333_s8 + $0x98] sm:$0xff]  ;;  %v974_v46 = vld [vmem:[%s3333_s8 + $0x90] sm:$0xff] }
  0x98   : > { %2026 = vmatpush3.msra.mxu0 %v694_v10  ;;  %2054 = vmatprep.subr.mxu1 %v2444_v3  ;;  %v973_v47 = vld [vmem:[%s3333_s8 + $0x88] sm:$0xff]  ;;  %v972_v48 = vld [vmem:[%s3333_s8 + $0x80] sm:$0xff]  ;;  %v813_v50 = vld [vmem:[#allocation9 + $0x10] sm:$0xff] }
  0x99   : > { %2027 = vmatprep.subr.mxu0 %v2444_v3  ;;  %2055 = vmatpush3.msra.mxu1 %v814_v30  ;;  %v954_v49 = vld [vmem:[%s2772_s20] sm:$0xff]  ;;  %v812_v51 = vld [vmem:[#allocation9 + $0x8] sm:$0xff]  ;;  %v1918_v56 = vld [vmem:[%s2715_s26 + $0x8] sm:$0xff]  ;;  %s2178_s20 = smul.u32 384, %s2554_s25  ;;  %s2447_s25 = smov [#allocation11]  }
  0x9a   : > { %2028 = vmatpush3.msra.mxu0 %v693_v11  ;;  %2056 = vmatprep.subr.mxu1 %v2444_v3  ;;  %v811_v52 = vld [vmem:[#allocation9] sm:$0xff]  ;;  %v929_v53 = vld [vmem:[%s2715_s26] sm:$0xff]  ;;  %v1079_v63 = vld [vmem:[%s3335_s10 + $0x78] sm:$0xff]  ;;  %s2361_s21 = sshll.u32 %s2447_s25, 4  ;;  %s2362_s21 = int_to_ptr.vmem [resolvable:$false] %s2361_s21 }
  0x9b   : > { %2029 = vmatprep.subr.mxu0 %v2444_v3  ;;  %2057 = vmatpush3.msra.mxu1 %v813_v50  ;;  %v1919_v54 = vld [vmem:[%s2715_s26 + $0x10] sm:$0xff]  ;;  %v1078_v4 = vld [vmem:[%s3335_s10 + $0x70] sm:$0xff]  ;;  %v1077_v7 = vld [vmem:[%s3335_s10 + $0x68] sm:$0xff]  ;;  %s3388_s26 = sld [smem:[#allocation28_spill]]  ;;  %s2363_s0 = scalar_lea.vmem %s2362_s21, 768 }
  0x9c   : > { %2030 = vmatpush3.msra.mxu0 %v692_v14  ;;  %2058 = vmatprep.subr.mxu1 %v2444_v3  ;;  %v1908_v57 = vld [vmem:[%s3330_s5] ss:$0 sm:$0xff]  ;;  %v1075_v13 = vld [vmem:[%s3335_s10 + $0x58] sm:$0xff]  ;;  %v1074_v15 = vld [vmem:[%s3335_s10 + $0x50] sm:$0xff]  ;;  %p2364_p4 = scmp.lt.s32.totalorder %s1752_s6, %s2362_s21 }
  0x9d   : > { %2031 = vmatprep.subr.mxu0 %v2444_v3  ;;  %2059 = vmatpush3.msra.mxu1 %v812_v51  ;;  %v1076_v10 = vld [vmem:[%s3335_s10 + $0x60] sm:$0xff]  ;;  %v1070_v19 = vld [vmem:[%s3335_s10 + $0x30] sm:$0xff]  ;;  %v1219_v51 = vld [vmem:[%s3338_s13 + $0xe8] sm:$0xff] }
  0x9e   : > { %2032 = vmatpush3.msra.mxu0 %v691_v16  ;;  %2060 = vmatprep.subr.mxu1 %v2444_v3  ;;  %v1073_v16 = vld [vmem:[%s3335_s10 + $0x48] sm:$0xff]  ;;  %v1066_v23 = vld [vmem:[%s3335_s10 + $0x10] sm:$0xff]  ;;  %v1218_v50 = vld [vmem:[%s3338_s13 + $0xe0] sm:$0xff] }
  0x9f   : > { %2034 = vmatmul.mubr.msk.f32.vlgmr.msra.gmra.mxu0 %vm708_vm2, %v688_v17  ;;  %991 = vmatprep.subr.mxu0 %v2444_v3  ;;  %v1072_v17 = vld [vmem:[%s3335_s10 + $0x40] sm:$0xff] }
  0xa0   : > { %992 = vmatpush1.msra.mxu0 %v971_v18  ;;  %2036 = vmatprep.mubr.msk.f32.mxu0 %vm2445_vm0, %v2444_v3  ;;  %v1071_v18 = vld [vmem:[%s3335_s10 + $0x38] sm:$0xff] }
  0xa1   : > { %993 = vmatprep.subr.mxu0 %v2444_v3  ;;  %2061 = vmatpush3.msra.mxu1 %v811_v52  ;;  %v1217_v52 = vld [vmem:[%s3338_s13 + $0xd8] sm:$0xff]  ;;  %s3289_s19 = scalar_lea.hbm %s3388_s26, %s2178_s20 }
  0xa2   : > { %994 = vmatpush1.msra.mxu0 %v970_v20  ;;  %2071 = vmatprep.subr.mxu1 %v2444_v3  ;;  %v1069_v20 = vld [vmem:[%s3335_s10 + $0x28] sm:$0xff] }
  0xa3   : > { %2037 = vmatmul.mubr.msk.f32.gmra.mxu0 %vm708_vm2, %v689_v21  ;;  %995 = vmatprep.subr.mxu0 %v2444_v3  ;;  %v1068_v21 = vld [vmem:[%s3335_s10 + $0x20] sm:$0xff] }
  0xa4   : > { %996 = vmatpush1.msra.mxu0 %v969_v22  ;;  %2039 = vmatprep.mubr.msk.f32.mxu0 %vm2445_vm0, %v2444_v3  ;;  %v1067_v22 = vld [vmem:[%s3335_s10 + $0x18] sm:$0xff] }
  0xa5   : > { %997 = vmatprep.subr.mxu0 %v2444_v3  ;;  %2252 = vset.pattern.permute.xlu1 %v2446_v55  ;;  %v1214_v55 = vld [vmem:[%s3338_s13 + $0xc0] sm:$0xff] }
  0xa6   : > { %998 = vmatpush1.msra.mxu0 %v968_v24  ;;  %932 = vperm.xlu0 %2251, %v929_v53   ;;  %v1065_v24 = vld [vmem:[%s3335_s10 + $0x8] sm:$0xff] }
  0xa7   : > { %2040 = vmatmul.mubr.msk.f32.gmra.mxu0 %vm708_vm2, %v690_v25  ;;  %999 = vmatprep.subr.mxu0 %v2444_v3  ;;  %v1064_v25 = vld [vmem:[%s3335_s10] sm:$0xff]  ;;  %v1215_v53 = vld [vmem:[%s3338_s13 + $0xc8] sm:$0xff] }
  0xa8   : > { %1000 = vmatpush1.msra.mxu0 %v967_v26  ;;  %1921 = vmatprep.mubr.msk.f32.mxu0 %vm987_vm3, %v955_v27  ;;  %v1920_v26 = vld [vmem:[%s3334_s9] ss:$0 sm:$0xff] }
  0xa9   : > { %1001 = vmatprep.subr.mxu0 %v2444_v3  ;;  %949 = vperm.xlu1 %2252, %v1919_v54   ;;  %v1216_v54 = vld [vmem:[%s3338_s13 + $0xd0] sm:$0xff] }
  0xaa   : > { %1002 = vmatpush1.msra.mxu0 %v966_v29  ;;  %940 = vperm.xlu0 %2251, %v1918_v56   ;;  %v1212_v56 = vld [vmem:[%s3338_s13 + $0xb0] sm:$0xff] }
  0xab   : > { %1003 = vmatprep.subr.mxu0 %v2444_v3 }
  0xac   : > { %1004 = vmatpush1.msra.mxu0 %v965_v31 }
  0xad   : > { %1005 = vmatprep.subr.mxu0 %v2444_v3 }
  0xae   : > { %1006 = vmatpush1.msra.mxu0 %v964_v32  ;;  %v1236_v32 = vld [vmem:[%s3338_s13 + $0x170] sm:$0xff] }
  0xaf   : > { %1007 = vmatprep.subr.mxu0 %v2444_v3 }
  0xb0   : > { %1008 = vmatpush1.msra.mxu0 %v963_v33  ;;  %v1235_v33 = vld [vmem:[%s3338_s13 + $0x168] sm:$0xff] }
  0xb1   : > { %1009 = vmatprep.subr.mxu0 %v2444_v3 }
  0xb2   : > { %1010 = vmatpush1.msra.mxu0 %v962_v34  ;;  %v1237_v34 = vld [vmem:[%s3338_s13 + $0x178] sm:$0xff] }
  0xb3   : > { %1011 = vmatprep.subr.mxu0 %v2444_v3 }
  0xb4   : > { %1012 = vmatpush1.msra.mxu0 %v961_v35  ;;  %v1233_v35 = vld [vmem:[%s3338_s13 + $0x158] sm:$0xff] }
  0xb5   : > { %1013 = vmatprep.subr.mxu0 %v2444_v3 }
  0xb6   : > { %1014 = vmatpush1.msra.mxu0 %v960_v36  ;;  %v1232_v36 = vld [vmem:[%s3338_s13 + $0x150] sm:$0xff] }
  0xb7   : > { %1015 = vmatprep.subr.mxu0 %v2444_v3 }
  0xb8   : > { %1016 = vmatpush1.msra.mxu0 %v959_v37  ;;  %v1234_v37 = vld [vmem:[%s3338_s13 + $0x160] sm:$0xff] }
  0xb9   : > { %1017 = vmatprep.subr.mxu0 %v2444_v3 }
  0xba   : > { %1018 = vmatpush1.msra.mxu0 %v958_v38  ;;  %v1230_v38 = vld [vmem:[%s3338_s13 + $0x140] sm:$0xff] }
  0xbb   : > { %1019 = vmatprep.subr.mxu0 %v2444_v3 }
  0xbc   : > { %1020 = vmatpush1.msra.mxu0 %v957_v39  ;;  %v1231_v39 = vld [vmem:[%s3338_s13 + $0x148] sm:$0xff] }
  0xbd   : > { %1021 = vmatprep.subr.mxu0 %v2444_v3 }
  0xbe   : > { %1022 = vmatpush1.msra.mxu0 %v956_v40  ;;  %v1229_v40 = vld [vmem:[%s3338_s13 + $0x138] sm:$0xff] }
  0xbf   : > { %1039 = vmatprep.subr.mxu0 %v2444_v3 }
  0xc0   : > { %1040 = vmatpush2.msra.mxu0 %v979_v41  ;;  %v1227_v41 = vld [vmem:[%s3338_s13 + $0x128] sm:$0xff] }
  0xc1   : > { %1041 = vmatprep.subr.mxu0 %v2444_v3 }
  0xc2   : > { %1042 = vmatpush2.msra.mxu0 %v978_v42  ;;  %v1228_v42 = vld [vmem:[%s3338_s13 + $0x130] sm:$0xff] }
  0xc3   : > { %1043 = vmatprep.subr.mxu0 %v2444_v3 }
  0xc4   : > { %1044 = vmatpush2.msra.mxu0 %v977_v43  ;;  %v1226_v43 = vld [vmem:[%s3338_s13 + $0x120] sm:$0xff] }
  0xc5   : > { %1045 = vmatprep.subr.mxu0 %v2444_v3 }
  0xc6   : > { %1046 = vmatpush2.msra.mxu0 %v976_v44  ;;  %v1224_v44 = vld [vmem:[%s3338_s13 + $0x110] sm:$0xff] }
  0xc7   : > { %1047 = vmatprep.subr.mxu0 %v2444_v3 }
  0xc8   : > { %1048 = vmatpush2.msra.mxu0 %v975_v45  ;;  %v1225_v45 = vld [vmem:[%s3338_s13 + $0x118] sm:$0xff] }
  0xc9   : > { %1049 = vmatprep.subr.mxu0 %v2444_v3 }
  0xca   : > { %1050 = vmatpush2.msra.mxu0 %v974_v46  ;;  %v1223_v46 = vld [vmem:[%s3338_s13 + $0x108] sm:$0xff] }
  0xcb   : > { %1051 = vmatprep.subr.mxu0 %v2444_v3 }
  0xcc   : > { %1052 = vmatpush2.msra.mxu0 %v973_v47  ;;  %v1221_v47 = vld [vmem:[%s3338_s13 + $0xf8] sm:$0xff] }
  0xcd   : > { %1053 = vmatprep.subr.mxu0 %v2444_v3 }
  0xce   : > { %1054 = vmatpush2.msra.mxu0 %v972_v48  ;;  %v1222_v48 = vld [vmem:[%s3338_s13 + $0x100] sm:$0xff] }
  0xcf   : > { %1056 = vmatmul.mubr.f32.vlgmr.msra.gmra.mxu0 %v954_v49  ;;  %2106 = vmatprep.subr.mxu0 %v2444_v3  ;;  %v1220_v49 = vld [vmem:[%s3338_s13 + $0xf0] sm:$0xff] }
  0xd0   : > { %2138 = vmatprep.mubr.msk.f32.mxu0 %vm2445_vm0, %v2444_v3  ;;  %2107 = vmatpush3.msra.mxu0 %v1237_v34  ;;  %v1186_v34 = vld [vmem:[%s3337_s12 + $0xd0] sm:$0xff] }
  0xd1   : > { %2108 = vmatprep.subr.mxu0 %v2444_v3 }
  0xd2   : > { %2109 = vmatpush3.msra.mxu0 %v1234_v37 }
  0xd3   : > { %2110 = vmatprep.subr.mxu0 %v2444_v3 }
  0xd4   : > { %2111 = vmatpush3.msra.mxu0 %v1231_v39  ;;  %v1183_v39 = vld [vmem:[%s3337_s12 + $0xb8] sm:$0xff] }
  0xd5   : > { %2112 = vmatprep.subr.mxu0 %v2444_v3 }
  0xd6   : > { %2113 = vmatpush3.msra.mxu0 %v1228_v42 }
  0xd7   : > { %2114 = vmatprep.subr.mxu0 %v2444_v3 }
  0xd8   : > { %2115 = vmatpush3.msra.mxu0 %v1225_v45  ;;  %v1180_v45 = vld [vmem:[%s3337_s12 + $0xa0] sm:$0xff] }
  0xd9   : > { %2116 = vmatprep.subr.mxu0 %v2444_v3 }
  0xda   : > { %2117 = vmatpush3.msra.mxu0 %v1222_v48  ;;  %v1175_v48 = vld [vmem:[%s3337_s12 + $0x78] sm:$0xff] }
  0xdb   : > { %2118 = vmatprep.subr.mxu0 %v2444_v3 }
  0xdc   : > { %2119 = vmatpush3.msra.mxu0 %v1219_v51 }
  0xdd   : > { %2120 = vmatprep.subr.mxu0 %v2444_v3 }
  0xde   : > { %2121 = vmatpush3.msra.mxu0 %v1216_v54  ;;  %v1174_v54 = vld [vmem:[%s3337_s12 + $0x70] sm:$0xff] }
  0xdf   : > { %2122 = vmatprep.subr.mxu0 %v2444_v3 }
 0x121   : > { %v933_v42 = vpop.permute.xlu0 %932 }
 0x15f   : > { %v788_v58 = vpop.f32.mrf.mxu0 }
 0x160   : > { %v789_v59 = vadd.f32 %v1908_v57, %v788_v58  ;;  %v1211_v58 = vld [vmem:[%s3338_s13 + $0xa8] sm:$0xff] }
 0x161   : > { %v2035_v60 = vpop.f32.mrf.mxu0 }
 0x162   : > { %vm802_vm4 = vcmp.gt.f32.partialorder %v789_v59, 0.0  ;;  %v805_v61 = vmul.f32 0.01, %v789_v59  ;;  %v1210_v60 = vld [vmem:[%s3338_s13 + $0xa0] sm:$0xff] }
 0x163   : > { %v793_v62 = vpop.f32.mrf.mxu0 }
 0x164   : > { %v794_v0 = vadd.f32 %v1908_v57, %v793_v62  ;;  %v808_v1 = vsel %vm802_vm4, %v789_v59, %v805_v61  ;;  %v1209_v59 = vld [vmem:[%s3338_s13 + $0x98] sm:$0xff]  ;;  %v1208_v61 = vld [vmem:[%s3338_s13 + $0x90] sm:$0xff]  ;;  %v1206_v62 = vld [vmem:[%s3338_s13 + $0x80] sm:$0xff] }
 0x165   : > { %v2038_v2 = vpop.f32.mrf.mxu0  ;;  %2063 = vmatmul.mubr.msk.f32.vlgmr.msra.gmra.mxu1 %vm708_vm2, %v808_v1  ;;  %v1203_v1 = vld [vmem:[%s3338_s13 + $0x68] sm:$0xff] }
 0x166   : > { %vm803_vm5 = vcmp.gt.f32.partialorder %v794_v0, 0.0  ;;  %v806_v5 = vmul.f32 0.01, %v794_v0  ;;  %2065 = vmatprep.mubr.msk.f32.mxu1 %vm2445_vm0, %v2444_v3  ;;  %2072 = vmatpush3.msra.mxu1 %v1079_v63  ;;  %v1207_v63 = vld [vmem:[%s3338_s13 + $0x88] sm:$0xff]  ;;  %v1204_v2 = vld [vmem:[%s3338_s13 + $0x70] sm:$0xff] }
 0x167   : > { %v798_v6 = vpop.f32.mrf.mxu0  ;;  %2073 = vmatprep.subr.mxu1 %v2444_v3 }
 0x168   : > { %v799_v8 = vadd.f32 %v1908_v57, %v798_v6  ;;  %v809_v9 = vsel %vm803_vm5, %v794_v0, %v806_v5  ;;  %2074 = vmatpush3.msra.mxu1 %v1078_v4  ;;  %v1213_v57 = vld [vmem:[%s3338_s13 + $0xb8] sm:$0xff]  ;;  %v1202_v4 = vld [vmem:[%s3338_s13 + $0x60] sm:$0xff]  ;;  %v1200_v5 = vld [vmem:[%s3338_s13 + $0x50] sm:$0xff] }
 0x169   : > { %2066 = vmatmul.mubr.msk.f32.gmra.mxu1 %vm708_vm2, %v809_v9  ;;  %2075 = vmatprep.subr.mxu1 %v2444_v3  ;;  %v2041_v11 = vpop.f32.mrf.mxu0  ;;  %v1205_v0 = vld [vmem:[%s3338_s13 + $0x78] sm:$0xff]  ;;  %v1196_v9 = vld [vmem:[%s3338_s13 + $0x30] sm:$0xff] }
 0x16a   : > { %vm804_vm6 = vcmp.gt.f32.partialorder %v799_v8, 0.0  ;;  %v807_v12 = vmul.f32 0.01, %v799_v8  ;;  %2068 = vmatprep.mubr.msk.f32.mxu1 %vm2445_vm0, %v2444_v3  ;;  %2076 = vmatpush3.msra.mxu1 %v1077_v7  ;;  %v1201_v6 = vld [vmem:[%s3338_s13 + $0x58] sm:$0xff]  ;;  %v1199_v7 = vld [vmem:[%s3338_s13 + $0x48] sm:$0xff]  ;;  %v1194_v11 = vld [vmem:[%s3338_s13 + $0x20] sm:$0xff] }
 0x16b   : > { %2077 = vmatprep.subr.mxu1 %v2444_v3  ;;  %2123 = vmatpush3.msra.mxu0 %v1213_v57 }
 0x16c   : > { %v810_v14 = vsel %vm804_vm6, %v799_v8, %v807_v12  ;;  %2078 = vmatpush3.msra.mxu1 %v1076_v10  ;;  %2124 = vmatprep.subr.mxu0 %v2444_v3  ;;  %v1197_v8 = vld [vmem:[%s3338_s13 + $0x38] sm:$0xff]  ;;  %v1198_v10 = vld [vmem:[%s3338_s13 + $0x40] sm:$0xff] }
 0x16d   : > { %2069 = vmatmul.mubr.msk.f32.gmra.mxu1 %vm708_vm2, %v810_v14  ;;  %2079 = vmatprep.subr.mxu1 %v2444_v3  ;;  %v1193_v12 = vld [vmem:[%s3338_s13 + $0x18] sm:$0xff]  ;;  %v1191_v14 = vld [vmem:[%s3338_s13 + $0x8] sm:$0xff] }
 0x16e   : > { %2080 = vmatpush3.msra.mxu1 %v1075_v13  ;;  %2103 = vmatprep.mubr.msk.f32.mxu1 %vm2445_vm0, %v2444_v3  ;;  %v1195_v13 = vld [vmem:[%s3338_s13 + $0x28] sm:$0xff] }
 0x16f   : > { %2081 = vmatprep.subr.mxu1 %v2444_v3  ;;  %2125 = vmatpush3.msra.mxu0 %v1210_v60  ;;  %v1167_v60 = vld [vmem:[%s3337_s12 + $0x38] sm:$0xff] }
 0x170   : > { %2082 = vmatpush3.msra.mxu1 %v1074_v15  ;;  %2126 = vmatprep.subr.mxu0 %v2444_v3  ;;  %v1190_v15 = vld [vmem:[%s3338_s13] sm:$0xff] }
 0x171   : > { %2083 = vmatprep.subr.mxu1 %v2444_v3  ;;  %2127 = vmatpush3.msra.mxu0 %v1207_v63 }
 0x172   : > { %2084 = vmatpush3.msra.mxu1 %v1073_v16  ;;  %2128 = vmatprep.subr.mxu0 %v2444_v3  ;;  %v1192_v16 = vld [vmem:[%s3338_s13 + $0x10] sm:$0xff] }
 0x173   : > { %2085 = vmatprep.subr.mxu1 %v2444_v3  ;;  %2129 = vmatpush3.msra.mxu0 %v1204_v2 }
 0x174   : > { %2086 = vmatpush3.msra.mxu1 %v1072_v17  ;;  %2130 = vmatprep.subr.mxu0 %v2444_v3  ;;  %v1188_v17 = vld [vmem:[%s3337_s12 + $0xe0] sm:$0x1f] }
 0x175   : > { %2087 = vmatprep.subr.mxu1 %v2444_v3  ;;  %2131 = vmatpush3.msra.mxu0 %v1201_v6  ;;  %v1165_v6 = vld [vmem:[%s3337_s12 + $0x28] sm:$0xff] }
 0x176   : > { %2088 = vmatpush3.msra.mxu1 %v1071_v18  ;;  %2132 = vmatprep.subr.mxu0 %v2444_v3 }
 0x177   : > { %2089 = vmatprep.subr.mxu1 %v2444_v3  ;;  %2133 = vmatpush3.msra.mxu0 %v1198_v10  ;;  %v1160_v10 = vld [vmem:[%s3337_s12] sm:$0xff] }
 0x178   : > { %2090 = vmatpush3.msra.mxu1 %v1070_v19  ;;  %2134 = vmatprep.subr.mxu0 %v2444_v3 }
 0x179   : > { %2091 = vmatprep.subr.mxu1 %v2444_v3  ;;  %2135 = vmatpush3.msra.mxu0 %v1195_v13 }
 0x17a   : > { %2092 = vmatpush3.msra.mxu1 %v1069_v20  ;;  %2136 = vmatprep.subr.mxu0 %v2444_v3 }
 0x17b   : > { %2093 = vmatprep.subr.mxu1 %v2444_v3  ;;  %2137 = vmatpush3.msra.mxu0 %v1192_v16  ;;  %v1540_v16 = vld [vmem:[%s3339_s14 + $0x38] sm:$0xff] }
 0x17c   : > { %2094 = vmatpush3.msra.mxu1 %v1068_v21  ;;  %2141 = vmatprep.subr.mxu0 %v2444_v3 }
 0x17d   : > { %2095 = vmatprep.subr.mxu1 %v2444_v3 }
 0x17e   : > { %2096 = vmatpush3.msra.mxu1 %v1067_v22 }
 0x17f   : > { %2097 = vmatprep.subr.mxu1 %v2444_v3 }
 0x180   : > { %2098 = vmatpush3.msra.mxu1 %v1066_v23 }
 0x181   : > { %2099 = vmatprep.subr.mxu1 %v2444_v3 }
 0x182   : > { %2100 = vmatpush3.msra.mxu1 %v1065_v24  ;;  %v1922_v24 = vld [vmem:[%s3336_s11] ss:$0 sm:$0xff] }
 0x183   : > { %2101 = vmatprep.subr.mxu1 %v2444_v3 }
 0x184   : > { %2102 = vmatpush3.msra.mxu1 %v1064_v25 }
 0x185   : > { %1238 = vmatprep.subr.mxu1 %v1236_v32  ;;  %v1185_v32 = vld [vmem:[%s3337_s12 + $0xc8] sm:$0xff] }
 0x18f   : > { %v1057_v27 = vpop.f32.mrf.mxu0 }
 0x190   : > { %v1058_v28 = vadd.f32 %v1920_v26, %v1057_v27 }
 0x191   : > { %v1059_v29 = vpop.f32.mrf.mxu0 }
 0x192   : > { %vm1061_vm7 = vcmp.gt.f32.partialorder %v1058_v28, 0.0  ;;  %v1062_v30 = vmul.f32 0.01, %v1058_v28  ;;  %v1187_v29 = vld [vmem:[%s3337_s12 + $0xd8] sm:$0x1f] }
 0x194   : > { %v1063_v31 = vsel %vm1061_vm7, %v1058_v28, %v1062_v30  ;;  %v1189_v30 = vld [vmem:[%s3337_s12 + $0xe8] sm:$0x1f] }
 0x195   : > { %2104 = vmatmul.mubr.f32.vlgmr.msra.gmra.mxu1 %v1063_v31 }
 0x196   : > { %1302 = vmatprep.mubr.f32.mxu1 %v2444_v3  ;;  %1239 = vmatpush1.msra.mxu1 %v1235_v33  ;;  %v1184_v33 = vld [vmem:[%s3337_s12 + $0xc0] sm:$0xff] }
 0x197   : > { %1240 = vmatprep.subr.mxu1 %v1233_v35  ;;  %v1913_v35 = vld [vmem:[%s3332_s7] ss:$0 sm:$0xff] }
 0x198   : > { %1241 = vmatpush1.msra.mxu1 %v1232_v36  ;;  %v1182_v36 = vld [vmem:[%s3337_s12 + $0xb0] sm:$0xff] }
 0x199   : > { %1242 = vmatprep.subr.mxu1 %v1230_v38  ;;  %v1181_v38 = vld [vmem:[%s3337_s12 + $0xa8] sm:$0xff] }
 0x19a   : > { %1243 = vmatpush1.msra.mxu1 %v1229_v40  ;;  %v1179_v40 = vld [vmem:[%s3337_s12 + $0x98] sm:$0xff] }
 0x19b   : > { %1244 = vmatprep.subr.mxu1 %v1227_v41 }
 0x19c   : > { %1245 = vmatpush1.msra.mxu1 %v1226_v43 }
 0x19d   : > { %1246 = vmatprep.subr.mxu1 %v1224_v44  ;;  %v1178_v44 = vld [vmem:[%s3337_s12 + $0x90] sm:$0xff] }
 0x19e   : > { %1247 = vmatpush1.msra.mxu1 %v1223_v46  ;;  %v1176_v46 = vld [vmem:[%s3337_s12 + $0x80] sm:$0xff] }
 0x19f   : > { %1248 = vmatprep.subr.mxu1 %v1221_v47 }
 0x1a0   : > { %1249 = vmatpush1.msra.mxu1 %v1220_v49  ;;  %v1177_v49 = vld [vmem:[%s3337_s12 + $0x88] sm:$0xff] }
 0x1a1   : > { %1250 = vmatprep.subr.mxu1 %v1218_v50  ;;  %v1173_v50 = vld [vmem:[%s3337_s12 + $0x68] sm:$0xff] }
 0x1a2   : > { %1251 = vmatpush1.msra.mxu1 %v1217_v52 }
 0x1a3   : > { %1252 = vmatprep.subr.mxu1 %v1215_v53  ;;  %v1172_v53 = vld [vmem:[%s3337_s12 + $0x60] sm:$0xff] }
 0x1a4   : > { %1253 = vmatpush1.msra.mxu1 %v1214_v55  ;;  %v1170_v55 = vld [vmem:[%s3337_s12 + $0x50] sm:$0xff] }
 0x1a5   : > { %1254 = vmatprep.subr.mxu1 %v1212_v56  ;;  %v941_v56 = vpop.permute.xlu0 %940 }
 0x1a6   : > { %1255 = vmatpush1.msra.mxu1 %v1211_v58  ;;  %v1169_v58 = vld [vmem:[%s3337_s12 + $0x48] sm:$0xff] }
 0x1a7   : > { %1256 = vmatprep.subr.mxu1 %v1209_v59  ;;  %v1171_v59 = vld [vmem:[%s3337_s12 + $0x58] sm:$0xff] }
 0x1a8   : > { %1257 = vmatpush1.msra.mxu1 %v1208_v61 }
 0x1a9   : > { %1258 = vmatprep.subr.mxu1 %v1206_v62  ;;  %v950_v62 = vpop.permute.xlu1 %949 }
 0x1aa   : > { %1259 = vmatpush1.msra.mxu1 %v1205_v0  ;;  %v1166_v0 = vld [vmem:[%s3337_s12 + $0x30] sm:$0xff] }
 0x1ab   : > { %1260 = vmatprep.subr.mxu1 %v1203_v1  ;;  %v1168_v1 = vld [vmem:[%s3337_s12 + $0x40] sm:$0xff] }
 0x1ac   : > { %1261 = vmatpush1.msra.mxu1 %v1202_v4  ;;  %v1164_v4 = vld [vmem:[%s3337_s12 + $0x20] sm:$0xff] }
 0x1ad   : > { %1262 = vmatprep.subr.mxu1 %v1200_v5  ;;  %v1163_v5 = vld [vmem:[%s3337_s12 + $0x18] sm:$0xff] }
 0x1ae   : > { %1263 = vmatpush1.msra.mxu1 %v1199_v7 }
 0x1af   : > { %1264 = vmatprep.subr.mxu1 %v1197_v8 }
 0x1b0   : > { %1265 = vmatpush1.msra.mxu1 %v1196_v9  ;;  %v1161_v9 = vld [vmem:[%s3337_s12 + $0x8] sm:$0xff] }
 0x1b1   : > { %1266 = vmatprep.subr.mxu1 %v1194_v11 }
 0x1b2   : > { %1267 = vmatpush1.msra.mxu1 %v1193_v12  ;;  %v1162_v12 = vld [vmem:[%s3337_s12 + $0x10] sm:$0xff] }
 0x1b3   : > { %1268 = vmatprep.subr.mxu1 %v1191_v14  ;;  %v1543_v14 = vld [vmem:[%s3339_s14 + $0x50] sm:$0x7] }
 0x1b4   : > { %1269 = vmatpush1.msra.mxu1 %v1190_v15  ;;  %v1542_v15 = vld [vmem:[%s3339_s14 + $0x48] sm:$0x7] }
 0x1b5   : > { %1923 = vmatprep.subr.msk.mxu1 %vm718_vm1, %v1188_v17  ;;  %v1539_v17 = vld [vmem:[%s3339_s14 + $0x30] sm:$0xff] }
 0x225   : > { %v906_v18 = vpop.f32.mrf.mxu1 }
 0x226   : > { %v907_v41 = vadd.f32 %v1913_v35, %v906_v18  ;;  %v1537_v18 = vld [vmem:[%s3339_s14 + $0x20] sm:$0xff] }
 0x227   : > { %v2064_v19 = vpop.f32.mrf.mxu1 }
 0x228   : > { %v923_v51 = vmul.f32 0.01, %v907_v41  ;;  %vm920_vm10 = vcmp.gt.f32.partialorder %v907_v41, 0.0  ;;  %v1536_v19 = vld [vmem:[%s3339_s14 + $0x18] sm:$0xff] }
 0x229   : > { %v911_v20 = vpop.f32.mrf.mxu1 }
 0x22a   : > { %v912_v37 = vadd.f32 %v1913_v35, %v911_v20  ;;  %v926_v61 = vsel %vm920_vm10, %v907_v41, %v923_v51  ;;  %v1534_v20 = vld [vmem:[%s3339_s14 + $0x8] sm:$0xff] }
 0x22b   : > { %v2067_v21 = vpop.f32.mrf.mxu1  ;;  %v935_v7 = vmul.f32 %v933_v42, %v926_v61 }
 0x22c   : > { %v924_v47 = vmul.f32 0.01, %v912_v37  ;;  %vm921_vm9 = vcmp.gt.f32.partialorder %v912_v37, 0.0  ;;  %v1533_v21 = vld [vmem:[%s3339_s14] sm:$0xff] }
 0x22d   : > { %v916_v22 = vpop.f32.mrf.mxu1 }
 0x22e   : > { %v917_v43 = vadd.f32 %v1913_v35, %v916_v22  ;;  %v927_v57 = vsel %vm921_vm9, %v912_v37, %v924_v47  ;;  %v1532_v22 = vld [vmem:[%s2717_s4] sm:$0xff]  ;;  %s2357_s4 = scalar_lea.vmem %s1752_s6, 384 }
 0x22f   : > { %v2070_v23 = vpop.f32.mrf.mxu1  ;;  %v943_v2 = vmul.f32 %v941_v56, %v927_v57  ;;  %v1703_v37 = vld [vmem:[%s3386_s23] sm:$0x7]  ;;  %p2358_p7 = scmp.ne.s32.totalorder %s1752_s6, %s2357_s4  ;;  %p2365_p6 = scmp.lt.s32.totalorder %s2363_s0, %s2357_s4 }
 0x230   : > { %v925_v52 = vmul.f32 0.01, %v917_v43  ;;  %vm922_vm11 = vcmp.gt.f32.partialorder %v917_v43, 0.0  ;;  %v1544_v23 = vld [vmem:[%s3339_s14 + $0x58] sm:$0x7] }
 0x231   : > { %v944_v11 = vadd.f32 %v943_v2, %v935_v7  ;;  %p2359_p12 = pnand %p2358_p7, %p3389_p9  ;;  %p2366_p11 = por %p2365_p6, %p2364_p4 }
 0x232   : > { %v928_v63 = vsel %vm922_vm11, %v917_v43, %v925_v52 }
 0x233   : > { %v952_v8 = vmul.f32 %v950_v62, %v928_v63  ;;  %p2360_p8 = pneg %p2359_p12 }
 0x235   : > { %v953_v13 = vadd.f32 %v952_v8, %v944_v11  ;;  %p2367_p2 = pnand %p2366_p11, %p2360_p8 }
 0x255   : > { %v1153_v25 = vpop.f32.mrf.mxu1 }
 0x256   : > { %v1154_v26 = vadd.f32 %v1922_v24, %v1153_v25  ;;  %v1541_v24 = vld [vmem:[%s3339_s14 + $0x40] sm:$0xff]  ;;  %v1538_v25 = vld [vmem:[%s3339_s14 + $0x28] sm:$0xff] }
 0x257   : > { %v2105_v27 = vpop.f32.mrf.mxu1 }
 0x258   : > { %vm1157_vm8 = vcmp.gt.f32.partialorder %v1154_v26, 0.0  ;;  %v1158_v28 = vmul.f32 0.01, %v1154_v26 }
 0x25a   : > { %v1159_v31 = vsel %vm1157_vm8, %v1154_v26, %v1158_v28  ;;  %v1535_v26 = vld [vmem:[%s3339_s14 + $0x10] sm:$0xff] }
 0x25b   : > { %1303 = vmatmul.mubr.f32.vlgmr.msra.gmra.mxu1 %v1159_v31  ;;  %2139 = vmatmul.mubr.f32.vlgmr.msra.gmra.mxu0 %v1159_v31 }
 0x25c   : > { %1924 = vmatpush1.msk.msra.mxu1 %vm718_vm1, %v1187_v29  ;;  %2142 = vmatpush3.msk.msra.mxu0 %vm718_vm1, %v1189_v30  ;;  %v1705_v29 = vlaneseq  ;;  %vm1734_vm1 = vcmask 7168  }
 0x25d   : > { %1405 = vmatprep.subr.mxu1 %v1185_v32  ;;  %2143 = vmatprep.subr.mxu0 %v2444_v3 }
 0x25e   : > { %1406 = vmatpush1.msra.mxu1 %v1184_v33  ;;  %2144 = vmatpush3.msra.mxu0 %v1186_v34  ;;  %v1706_v32 = vshrl.u32 %v1705_v29, 7 }
 0x25f   : > { %1407 = vmatprep.subr.mxu1 %v1182_v36  ;;  %2145 = vmatprep.subr.mxu0 %v2444_v3 }
 0x260   : > { %1408 = vmatpush1.msra.mxu1 %v1181_v38  ;;  %2146 = vmatpush3.msra.mxu0 %v1183_v39  ;;  %v1707_v36 = vsub.s32 0, %v1706_v32  ;;  %v1711_v38 = vsub.s32 1, %v1706_v32 }
 0x261   : > { %1409 = vmatprep.subr.mxu1 %v1179_v40  ;;  %2147 = vmatprep.subr.mxu0 %v2444_v3 }
 0x262   : > { %1410 = vmatpush1.msra.mxu1 %v1178_v44  ;;  %2148 = vmatpush3.msra.mxu0 %v1180_v45  ;;  %v1708_v40 = vrot.slane %v1703_v37, %v1707_v36  ;;  %v1712_v44 = vrot.slane %v1703_v37, %v1711_v38 }
 0x263   : > { %1411 = vmatprep.subr.mxu1 %v1176_v46  ;;  %2149 = vmatprep.subr.mxu0 %v2444_v3  ;;  %v1715_v46 = vsub.s32 2, %v1706_v32 }
 0x264   : > { %1412 = vmatpush1.msra.mxu1 %v1175_v48  ;;  %2150 = vmatpush3.msra.mxu0 %v1177_v49 }
 0x265   : > { %1413 = vmatprep.subr.mxu1 %v1173_v50  ;;  %2151 = vmatprep.subr.mxu0 %v2444_v3  ;;  %v1716_v51 = vrot.slane %v1703_v37, %v1715_v46 }
 0x266   : > { %1414 = vmatpush1.msra.mxu1 %v1172_v53  ;;  %2152 = vmatpush3.msra.mxu0 %v1174_v54 }
 0x267   : > { %1415 = vmatprep.subr.mxu1 %v1170_v55  ;;  %2153 = vmatprep.subr.mxu0 %v2444_v3 }
 0x268   : > { %1416 = vmatpush1.msra.mxu1 %v1169_v58  ;;  %2154 = vmatpush3.msra.mxu0 %v1171_v59 }
 0x269   : > { %1417 = vmatprep.subr.mxu1 %v1167_v60  ;;  %2155 = vmatprep.subr.mxu0 %v2444_v3 }
 0x26a   : > { %1418 = vmatpush1.msra.mxu1 %v1166_v0  ;;  %2156 = vmatpush3.msra.mxu0 %v1168_v1 }
 0x26b   : > { %1419 = vmatprep.subr.mxu1 %v1164_v4  ;;  %2157 = vmatprep.subr.mxu0 %v2444_v3 }
 0x26c   : > { %1420 = vmatpush1.msra.mxu1 %v1163_v5  ;;  %2158 = vmatpush3.msra.mxu0 %v1165_v6 }
 0x26d   : > { %1421 = vmatprep.subr.mxu1 %v1161_v9  ;;  %2159 = vmatprep.subr.mxu0 %v2444_v3 }
 0x26e   : > { %1422 = vmatpush1.msra.mxu1 %v1160_v10  ;;  %1455 = vmatprep.mubr.f32.mxu1 %v2444_v3 }
 0x26f   : > { %2160 = vmatpush3.msra.mxu0 %v1162_v12  ;;  %2161 = vmatprep.mubr.msk.f32.mxu0 %vm2445_vm0, %v2444_v3 }
 0x270   : > { %1925 = vmatmul.mubr.msk.f32.vlgmr.msra.gmra.mxu1 %vm708_vm2, %v953_v13  ;;  %2162 = vmatmul.mubr.msk.f32.vlgmr.msra.gmra.mxu0 %vm708_vm2, %v953_v13 }
 0x271   : > { %1928 = vmatprep.subr.msk.mxu1 %vm1549_vm12, %v1543_v14  ;;  %1623 = vmatprep.mubr.f32.mxu1 %v2444_v3 }
 0x272   : > { %1929 = vmatpush1.msk.msra.mxu1 %vm1549_vm12, %v1542_v15 }
 0x273   : > { %1585 = vmatprep.subr.mxu1 %v1540_v16 }
 0x274   : > { %1586 = vmatpush1.msra.mxu1 %v1539_v17 }
 0x275   : > { %1587 = vmatprep.subr.mxu1 %v1537_v18 }
 0x276   : > { %1588 = vmatpush1.msra.mxu1 %v1536_v19 }
 0x277   : > { %1589 = vmatprep.subr.mxu1 %v1534_v20 }
 0x278   : > { %1590 = vmatpush1.msra.mxu1 %v1533_v21 }
 0x279   : > { %1930 = vmatmul.mubr.msk.f32.vlgmr.msra.gmra.mxu1 %vm1545_vm13, %v1532_v22  ;;  %2164 = vmatprep.subr.mxu1 %v2444_v3 }
 0x27a   : > { %2165 = vmatpush3.msk.msra.mxu1 %vm1549_vm12, %v1544_v23  ;;  %2172 = vmatprep.mubr.msk.f32.mxu1 %vm2445_vm0, %v2444_v3 }
 0x27b   : > { %2166 = vmatprep.subr.mxu1 %v2444_v3 }
 0x27c   : > { %2167 = vmatpush3.msra.mxu1 %v1541_v24 }
 0x27d   : > { %2168 = vmatprep.subr.mxu1 %v2444_v3 }
 0x27e   : > { %2169 = vmatpush3.msra.mxu1 %v1538_v25 }
 0x27f   : > { %2170 = vmatprep.subr.mxu1 %v2444_v3 }
 0x280   : > { %2171 = vmatpush3.msra.mxu1 %v1535_v26 }
 0x281   : > { %2173 = vmatmul.mubr.msk.f32.vlgmr.msra.gmra.mxu1 %vm1545_vm13, %v1532_v22 }
 0x31b   : > { %v1375_v27 = vpop.f32.mrf.mxu0  ;;  %v1304_v30 = vpop.f32.mrf.mxu1 }
 0x31d   : > { %v2140_v28 = vpop.f32.mrf.mxu0  ;;  %v1306_v33 = vpop.f32.mrf.mxu1 }
 0x330   : > { %v1528_v31 = vpop.f32.mrf.mxu0  ;;  %v1457_v35 = vpop.f32.mrf.mxu1 }
 0x331   : > { %v1458_v3 = vadd.f32 %v1457_v35, %v1304_v30  ;;  %v1529_v52 = vadd.f32 %v1528_v31, %v1375_v27 }
 0x332   : > { %v2163_v34 = vpop.f32.mrf.mxu0  ;;  %v1459_v39 = vpop.f32.mrf.mxu1 }
 0x333   : > { %v1460_v42 = vadd.f32 %v1459_v39, %v1306_v33 }
 0x339   : > { %v1625_v41 = vpop.f32.mrf.mxu1 }
 0x33a   : > { %v1700_v43 = vadd.f32 %v1625_v41, %v1458_v3 }
 0x33b   : > { %v1627_v45 = vpop.f32.mrf.mxu1 }
 0x33c   : > { %v1720_v47 = vadd.f32 %v1708_v40, %v1700_v43  ;;  %v1701_v48 = vadd.f32 %v1627_v45, %v1460_v42 }
 0x33e   : > { %vm1723_vm14 = vcmp.gt.f32.partialorder %v1720_v47, 0.0  ;;  %v1726_v49 = vmul.f32 0.01, %v1720_v47  ;;  %v1721_v50 = vadd.f32 %v1712_v44, %v1701_v48 }
 0x340   : > { %v1729_v53 = vsel %vm1723_vm14, %v1720_v47, %v1726_v49  ;;  %vm1724_vm15 = vcmp.gt.f32.partialorder %v1721_v50, 0.0  ;;  %v1727_v54 = vmul.f32 0.01, %v1721_v50 }
 0x341   : > { %1732 = vst [vmem:[%s682_s18] sm:$0xff] %v1729_v53  ;;  %v1696_v55 = vpop.f32.mrf.mxu1 }
 0x342   : > { %v1730_v56 = vsel %vm1724_vm15, %v1721_v50, %v1727_v54  ;;  %v1702_v57 = vadd.f32 %v1696_v55, %v1529_v52 }
 0x343   : > { %1733 = vst [vmem:[%s682_s18 + $0x8] sm:$0xff] %v1730_v56  ;;  %v2174_v58 = vpop.f32.mrf.mxu1 }
 0x344   : > { %v1722_v59 = vadd.f32 %v1716_v51, %v1702_v57 }
 0x346   : > { %vm1725_vm0 = vcmp.gt.f32.partialorder %v1722_v59, 0.0  ;;  %v1728_v60 = vmul.f32 0.01, %v1722_v59 }
 0x348   : > { %v1731_v61 = vsel %vm1725_vm0, %v1722_v59, %v1728_v60 }
 0x349   : > { %1735 = vst.msk [vmem:[%s682_s18 + $0x10] sm:$0xff] %vm1734_vm1, %v1731_v61 }
 0x34a   : > { %2370 = shalt.err (!%p2367_p2)
}
 0x34b   : > { %s2371_s30 = scalar_lea.hbm %s3289_s19, 384  ;;  %s2375_s16 = scalar_lea.hbm %s3388_s26, 1152 }
 0x34c   : > { %p2372_p0 = scmp.ne.s32.totalorder %s3289_s19, %s2371_s30  ;;  %p2376_p10 = scmp.lt.s32.totalorder %s3289_s19, %s3388_s26 }
 0x34d   : > { %p2377_p1 = scmp.lt.s32.totalorder %s2375_s16, %s2371_s30 }
 0x34e   : > { %p2373_p5 = pnand %p2372_p0, %p3389_p9 }
 0x34f   : > { %p2378_p3 = por %p2377_p1, %p2376_p10 }
 0x350   : > { %p2374_p13 = pneg %p2373_p5 }
 0x352   : > { %p2379_p7 = pnand %p2378_p3, %p2374_p13 }
 0x354   : > { %2382 = shalt.err (!%p2379_p7)
}
 0x355   : > { %2191 = dma.vmem_to_hbm [thread:$0]  (%p3389_p9), %s1752_s6, 384, %s3289_s19, %s1737_s29  }
 0x356 PF: > { %s3390_s20 = sld [smem:[#allocation17_spill]]  ;;  %p2208_p12 = scmp.ge.s32.totalorder %s2433_s24, 2 }
 0x357   : > { %s3391_s15 = sld [smem:[#allocation22_spill]] }
 0x35c   : > { %s1763_s28 = sand.u32 1, %s3390_s20  }
 0x35d   : > { %p3392_p8 = scmp.ne.s32.totalorder %s3391_s15, 0  ;;  %s1764_s4 = scalar_lea.sflag [#allocation4], %s1763_s28 }
 0x35f   : > { %p2201_p4 = pnand %p2208_p12, %p3392_p8 }
 0x361   : > { %p2202_p6 = pneg %p2201_p4 }
 0x363   : > { %2416 = dma.done.wait (%p2202_p6), %s1764_s4, 384  }
 0x364   : > { %2418 = vsyncadd (%p2202_p6), %s1764_s4, 4294966912  ;;  %s3393_s24 = sld [smem:[#allocation19_spill]]  ;;  %s3396_s21 = smov %s2425_s22 }
 0x365   : > { %s3394_s25 = sld [smem:[#allocation18_spill]] }
 0x366   : > { %s3395_s23 = sld [smem:[#allocation20_spill]] }
 0x36a   : > { %p33_p11 = scmp.ge.s32.totalorder %s3393_s24, 5  }
 0x36b   : > { %s3397_s22 = smov %s3394_s25 }
 0x36c   :  { %35 = sbr.rel (!%p33_p11) target bundleno = 15 (0xf), region = 201 }
 0x371   :  { %1769 = vsyncpa [#allocation3], 1 }
 0x372   :  { %1771 = vsyncpa [#allocation3 + $0x1], 1 }
 0x373   :  { %1772 = vsyncpa [#allocation7], 1 }
 0x374   :  { %1774 = vsyncpa [#allocation7 + $0x1], 1 }
 0x375   :  { %1775 = vsyncpa [#allocation10], 1 }
 0x376   :  { %1776 = vsyncpa [#allocation4], 1 }
 0x377   :  { %1778 = vsyncpa [#allocation4 + $0x1], 1 }

</bundles_post_ra>
